<compile_context>
chip_gen: v5e
topology: v5e:2x2
jax: 0.10.0
libtpu: 0.0.40
codegen_flags: <defaults>
</compile_context>

<pallas_src>
import jax
import jax.numpy as jnp
from jax import lax
from jax.experimental import pallas as pl
from jax.experimental.pallas import tpu as pltpu
import numpy as np


# --------------------------- kernel building blocks ------------------------ #
def _issue_row_gather(tok_sref, table_hbm, gbuf, gsem, base, n_rows_blk, unroll):
    """Fan out one async HBM->VMEM row copy per token of this block."""
    def issue_row(r, carry):
        tok = tok_sref[base + r]
        pltpu.make_async_copy(table_hbm.at[tok], gbuf.at[r], gsem.at[r]).start()
        return carry
    lax.fori_loop(0, n_rows_blk, issue_row, 0, unroll=unroll)


def _wait_add_store(table_hbm, mod_ref, out_ref, gbuf, gsem, n_rows_blk, unroll):
    """Chunk-wise wait on the gather DMAs, fused modality add + dense store.

    Waiting 8 rows at a time lets the VPU add / store of arrived rows overlap
    with the DMAs of later rows (issued earlier, still in flight).
    """
    mod = mod_ref[...]                      # (1, E), loaded once per block
    n_chunks = n_rows_blk // 8
    def process_chunk(c, carry):
        r0 = pl.multiple_of(c * 8, 8)
        def wait_row(j, inner):
            # Wait descriptor only needs a matching dst shape + semaphore.
            pltpu.make_async_copy(table_hbm.at[0], gbuf.at[r0 + j],
                                  gsem.at[r0 + j]).wait()
            return inner
        lax.fori_loop(0, 8, wait_row, 0, unroll=True)
        out_ref[pl.ds(r0, 8), :] = (
            gbuf[pl.ds(r0, 8), :] + mod).astype(out_ref.dtype)
        return carry
    lax.fori_loop(0, n_chunks, process_chunk, 0, unroll=unroll)


# ------------------------------ Pallas kernels ----------------------------- #
def _text_embed_kernel(tok_sref,                 # scalar prefetch (SMEM)
                       table_hbm, mod_ref,       # HBM table, VMEM modality
                       out_ref,                  # (R, E) output block
                       gbuf, gsem):              # VMEM scratch + DMA sems
    R = out_ref.shape[0]
    unroll = R <= 64
    base = pl.program_id(0) * R
    _issue_row_gather(tok_sref, table_hbm, gbuf, gsem, base, R, unroll)
    _wait_add_store(table_hbm, mod_ref, out_ref, gbuf, gsem, R, unroll)


def _text_embed_pos_kernel(tok_sref, pid_sref,                   # SMEM prefetch
                           table_hbm, mod_ref, pos_cache_ref,    # inputs
                           out_ref, pos_out_ref,                 # outputs
                           gbuf, gsem):                          # scratch
    R = out_ref.shape[0]
    unroll = R <= 64
    base = pl.program_id(0) * R
    _issue_row_gather(tok_sref, table_hbm, gbuf, gsem, base, R, unroll)

    # Position gather from the VMEM-resident cache; runs while the token-row
    # DMAs are still landing.  (Non-default path; pos_dim may be < 128 so the
    # per-row store is lane-masked — acceptable for the fallback case.)
    def pos_row(r, carry):
        pid = pid_sref[base + r]
        pos_out_ref[pl.ds(r, 1), :] = (
            pos_cache_ref[pl.ds(pid, 1), :].astype(pos_out_ref.dtype))
        return carry
    lax.fori_loop(0, R, pos_row, 0, unroll=unroll)

    _wait_add_store(table_hbm, mod_ref, out_ref, gbuf, gsem, R, unroll)


# --------------------------------- Wrapper --------------------------------- #
def _round_up(x, m):
    return (x + m - 1) // m * m


def input_text_embedder(tokens, embed_table, pos_emb_cache, modality_embedding,
                        mask=None, pos_ids=None, block_rows=256):
    """Forward pass of InputTextEmbedder. Returns (embed, mask, position_embed)."""
    bs, seq = tokens.shape
    vocab, emb_dim = embed_table.shape
    max_len, pos_dim = pos_emb_cache.shape

    tokens = tokens.astype(jnp.int32)
    if mask is None:
        mask = (tokens > 0).astype(jnp.int32)     # single VPU compare, in wrapper
    else:
        mask = mask.astype(jnp.int32)

    itemsize = jnp.dtype(embed_table.dtype).itemsize
    pos_itemsize = jnp.dtype(pos_emb_cache.dtype).itemsize
    # Sublane packing: f32 -> 8, bf16 -> 16, int8 -> 32 rows per packed group.
    row_align = 8 * max(1, 4 // itemsize)

    n_rows = bs * seq
    R = min(_round_up(block_rows, row_align), _round_up(n_rows, row_align))
    n_padded = _round_up(n_rows, R)
    n_steps = n_padded // R

    # Explicit clamp: out-of-range ids would otherwise be a silent/OOB gather.
    tok_flat = jnp.clip(tokens.reshape(n_rows), 0, vocab - 1)
    if n_padded != n_rows:
        tok_flat = jnp.pad(tok_flat, (0, n_padded - n_rows))

    mod2d = modality_embedding.reshape(1, emb_dim).astype(embed_table.dtype)

    gather_pos = pos_ids is not None

    # VMEM budget (single-buffered gather scratch + double-buffered outputs);
    # clamp to 64 MiB so the same setting is valid on v7x.
    vmem_needed = (R * emb_dim * itemsize          # gather scratch
                   + 2 * R * emb_dim * itemsize    # double-buffered out block
                   + 2 * emb_dim * itemsize)       # modality block
    if gather_pos:
        vmem_needed += 2 * (max_len * pos_dim + R * pos_dim) * pos_itemsize
    vmem_limit = int(min(max(2 * vmem_needed, 16 << 20), 64 << 20))

    bytes_accessed = 2 * n_rows * emb_dim * itemsize + n_padded * 4
    if gather_pos:
        bytes_accessed += 2 * n_rows * pos_dim * pos_itemsize + n_padded * 4
    cost = pl.CostEstimate(flops=n_rows * emb_dim, transcendentals=0,
                           bytes_accessed=int(bytes_accessed))

    compiler_params = pltpu.CompilerParams(
        dimension_semantics=("parallel",),       # row blocks independent (v7x 2 TCs)
        vmem_limit_bytes=vmem_limit)

    if not gather_pos:
        grid_spec = pltpu.PrefetchScalarGridSpec(
            num_scalar_prefetch=1,                      # tok_flat -> SMEM
            grid=(n_steps,),
            in_specs=[
                pl.BlockSpec(memory_space=pl.ANY),              # table stays in HBM
                pl.BlockSpec((1, emb_dim), lambda i, tok: (0, 0)),  # modality, VMEM-resident
            ],
            out_specs=pl.BlockSpec((R, emb_dim), lambda i, tok: (i, 0)),
            scratch_shapes=[
                pltpu.VMEM((R, emb_dim), embed_table.dtype),    # gather buffer
                pltpu.SemaphoreType.DMA((R,)),                  # one sem per row DMA
            ])
        embed_flat = pl.pallas_call(
            _text_embed_kernel,
            grid_spec=grid_spec,
            out_shape=jax.ShapeDtypeStruct((n_padded, emb_dim), embed_table.dtype),
            compiler_params=compiler_params,
            cost_estimate=cost,
        )(tok_flat, embed_table, mod2d)
        # Default pos_ids = arange(seq) broadcast over batch: a free static
        # slice + broadcast in XLA — no kernel gather needed.
        pos_emb = jnp.broadcast_to(pos_emb_cache[:seq][None, :, :],
                                   (bs, seq, pos_dim))
    else:
        pid_flat = jnp.clip(pos_ids.astype(jnp.int32).reshape(n_rows),
                            0, max_len - 1)
        if n_padded != n_rows:
            pid_flat = jnp.pad(pid_flat, (0, n_padded - n_rows))
        grid_spec = pltpu.PrefetchScalarGridSpec(
            num_scalar_prefetch=2,                      # tok_flat, pid_flat -> SMEM
            grid=(n_steps,),
            in_specs=[
                pl.BlockSpec(memory_space=pl.ANY),                       # table (HBM)
                pl.BlockSpec((1, emb_dim), lambda i, tok, pid: (0, 0)),  # modality
                # Full pos cache resident in VMEM (constant block index).
                pl.BlockSpec((max_len, pos_dim), lambda i, tok, pid: (0, 0)),
            ],
            out_specs=(
                pl.BlockSpec((R, emb_dim), lambda i, tok, pid: (i, 0)),
                pl.BlockSpec((R, pos_dim), lambda i, tok, pid: (i, 0)),
            ),
            scratch_shapes=[
                pltpu.VMEM((R, emb_dim), embed_table.dtype),
                pltpu.SemaphoreType.DMA((R,)),
            ])
        embed_flat, pos_flat = pl.pallas_call(
            _text_embed_pos_kernel,
            grid_spec=grid_spec,
            out_shape=(
                jax.ShapeDtypeStruct((n_padded, emb_dim), embed_table.dtype),
                jax.ShapeDtypeStruct((n_padded, pos_dim), pos_emb_cache.dtype),
            ),
            compiler_params=compiler_params,
            cost_estimate=cost,
        )(tok_flat, pid_flat, embed_table, mod2d, pos_emb_cache)
        pos_emb = pos_flat[:n_rows].reshape(bs, seq, pos_dim)

    embed = embed_flat[:n_rows].reshape(bs, seq, emb_dim)
    return embed, mask, pos_emb


# ------------------------ Deterministic parameters ------------------------- #
def make_pos_emb_cache(max_len, pos_dim):
    # Deterministic sinusoidal-style cache standing in for
    # layers.get_1d_position_embedding(cfg.text_pos_emb, ...).
    # TODO(synk): exact llama_rope angle layout from uio2.layers not replicated;
    #             the forward (a row gather by pos_ids) is semantically identical.
    pos = np.arange(max_len, dtype=np.float32)[:, None]
    dim = np.arange(pos_dim, dtype=np.float32)[None, :]
    inv_freq = 1.0 / (10000.0 ** (2.0 * (dim // 2) / pos_dim))
    angles = pos * inv_freq
    cache = np.where(np.arange(pos_dim)[None, :] % 2 == 0,
                     np.sin(angles), np.cos(angles))
    return jnp.asarray(cache, dtype=jnp.float32)


# --------------------------------- Main ------------------------------------ #
if __name__ == "__main__":
    # Small config consistent with the module: text_pos_emb = "llama_rope"
    BS, SEQ = 2, 8
    VOCAB, EMB_DIM, HEAD_DIM = 256, 128, 64    # EMB_DIM lane-dense (multiple of 128)
    MAX_TEXT_LEN = 32
    POS_DIM = HEAD_DIM                         # width of pos_emb_cache rows

    key = jax.random.PRNGKey(0)
    k_tok, k_tab, k_mod, k_pid = jax.random.split(key, 4)

    tokens = jax.random.randint(k_tok, (BS, SEQ), 0, VOCAB, dtype=jnp.int32)
    embed_table = jax.random.normal(k_tab, (VOCAB, EMB_DIM), jnp.float32) * 0.02
    modality_embedding = jax.random.normal(k_mod, (EMB_DIM,), jnp.float32) * 0.02
    pos_emb_cache = make_pos_emb_cache(MAX_TEXT_LEN, POS_DIM)

    # ---- default path (pos_ids=None): kernel gathers tokens only ----------
    embed, mask, pos_emb = input_text_embedder(
        tokens, embed_table, pos_emb_cache, modality_embedding)
    jax.block_until_ready((embed, mask, pos_emb))

    ref_embed = jnp.take(embed_table, tokens, axis=0) + modality_embedding[None, None, :]
    ref_mask = (tokens > 0).astype(jnp.int32)
    ref_pos = jnp.take(pos_emb_cache,
                       jnp.broadcast_to(jnp.arange(SEQ)[None, :], (BS, SEQ)), axis=0)
    assert embed.shape == (BS, SEQ, EMB_DIM) and embed.dtype == jnp.float32
    assert mask.shape == (BS, SEQ) and mask.dtype == jnp.int32
    assert pos_emb.shape == (BS, SEQ, POS_DIM)
    np.testing.assert_allclose(np.asarray(embed), np.asarray(ref_embed),
                               rtol=1e-6, atol=1e-6)
    np.testing.assert_array_equal(np.asarray(mask), np.asarray(ref_mask))
    np.testing.assert_allclose(np.asarray(pos_emb), np.asarray(ref_pos),
                               rtol=1e-6, atol=1e-6)

    # ---- explicit pos_ids path: in-kernel gather from VMEM-resident cache --
    pos_ids = jax.random.randint(k_pid, (BS, SEQ), 0, MAX_TEXT_LEN, dtype=jnp.int32)
    embed2, mask2, pos_emb2 = input_text_embedder(
        tokens, embed_table, pos_emb_cache, modality_embedding, pos_ids=pos_ids)
    jax.block_until_ready((embed2, mask2, pos_emb2))

    ref_pos2 = jnp.take(pos_emb_cache, pos_ids, axis=0)
    np.testing.assert_allclose(np.asarray(embed2), np.asarray(ref_embed),
                               rtol=1e-6, atol=1e-6)
    np.testing.assert_allclose(np.asarray(pos_emb2), np.asarray(ref_pos2),
                               rtol=1e-6, atol=1e-6)

    print("KERNEL_OK")
</pallas_src>

<mosaic_0001>
module attributes {stable_mosaic.version = 11 : i64} {
  func.func @_text_embed_kernel(%arg0: i32, %arg1: memref<16xi32, #tpu.memory_space<smem>>, %arg2: memref<256x128xf32, #tpu.memory_space<any>>, %arg3: memref<1x128xf32, #tpu.memory_space<vmem>>, %arg4: memref<16x128xf32, #tpu.memory_space<vmem>>, %arg5: memref<16x128xf32, #tpu.memory_space<vmem>>, %arg6: memref<16x!tpu.dma_semaphore, #tpu.memory_space<semaphore_mem>>) attributes {dimension_semantics = [#tpu.dimension_semantics<parallel>], iteration_bounds = array<i64: 1>, scalar_prefetch = 1 : i64, scratch_operands = 2 : i64, tpu.core_type = #tpu.core_type<tc>, window_params = [{}, {pipeline_mode = #tpu.pipeline_mode<synchronous>, transform_indices = @transform_1, window_bounds = array<i64: 1, 128>}, {transform_indices = @transform_2, window_bounds = array<i64: 16, 128>}]} {
    %c16_i32 = arith.constant 16 : i32
    %0 = arith.muli %arg0, %c16_i32 : i32
    %c0_i32 = arith.constant 0 : i32
    %1 = arith.addi %0, %c0_i32 : i32
    %2 = arith.index_cast %1 : i32 to index
    %3 = memref.load %arg1[%2] : memref<16xi32, #tpu.memory_space<smem>>
    %c0_i32_0 = arith.constant 0 : i32
    %4 = tpu.memref_slice %arg2[%3, %c0_i32_0] : memref<256x128xf32, #tpu.memory_space<any>> -> memref<1x128xf32, #tpu.memory_space<any>>
    %5 = tpu.memref_squeeze %4 : memref<1x128xf32, #tpu.memory_space<any>> -> memref<128xf32, #tpu.memory_space<any>>
    %c0_i32_1 = arith.constant 0 : i32
    %6 = tpu.memref_slice %arg5[%c0_i32, %c0_i32_1] : memref<16x128xf32, #tpu.memory_space<vmem>> -> memref<1x128xf32, #tpu.memory_space<vmem>>
    %7 = tpu.memref_squeeze %6 : memref<1x128xf32, #tpu.memory_space<vmem>> -> memref<128xf32, #tpu.memory_space<vmem>>
    %8 = tpu.memref_slice %arg6[%c0_i32] : memref<16x!tpu.dma_semaphore, #tpu.memory_space<semaphore_mem>> -> memref<1x!tpu.dma_semaphore, #tpu.memory_space<semaphore_mem>>
    %9 = tpu.memref_squeeze %8 : memref<1x!tpu.dma_semaphore, #tpu.memory_space<semaphore_mem>> -> memref<!tpu.dma_semaphore, #tpu.memory_space<semaphore_mem>>
    tpu.enqueue_dma source(%5 : memref<128xf32, #tpu.memory_space<any>>) target(%7 : memref<128xf32, #tpu.memory_space<vmem>>) target_semaphore(%9 : memref<!tpu.dma_semaphore, #tpu.memory_space<semaphore_mem>>)
    %c1_i32 = arith.constant 1 : i32
    %10 = arith.addi %0, %c1_i32 : i32
    %11 = arith.index_cast %10 : i32 to index
    %12 = memref.load %arg1[%11] : memref<16xi32, #tpu.memory_space<smem>>
    %c0_i32_2 = arith.constant 0 : i32
    %13 = tpu.memref_slice %arg2[%12, %c0_i32_2] : memref<256x128xf32, #tpu.memory_space<any>> -> memref<1x128xf32, #tpu.memory_space<any>>
    %14 = tpu.memref_squeeze %13 : memref<1x128xf32, #tpu.memory_space<any>> -> memref<128xf32, #tpu.memory_space<any>>
    %c0_i32_3 = arith.constant 0 : i32
    %15 = tpu.memref_slice %arg5[%c1_i32, %c0_i32_3] : memref<16x128xf32, #tpu.memory_space<vmem>> -> memref<1x128xf32, #tpu.memory_space<vmem>>
    %16 = tpu.memref_squeeze %15 : memref<1x128xf32, #tpu.memory_space<vmem>> -> memref<128xf32, #tpu.memory_space<vmem>>
    %17 = tpu.memref_slice %arg6[%c1_i32] : memref<16x!tpu.dma_semaphore, #tpu.memory_space<semaphore_mem>> -> memref<1x!tpu.dma_semaphore, #tpu.memory_space<semaphore_mem>>
    %18 = tpu.memref_squeeze %17 : memref<1x!tpu.dma_semaphore, #tpu.memory_space<semaphore_mem>> -> memref<!tpu.dma_semaphore, #tpu.memory_space<semaphore_mem>>
    tpu.enqueue_dma source(%14 : memref<128xf32, #tpu.memory_space<any>>) target(%16 : memref<128xf32, #tpu.memory_space<vmem>>) target_semaphore(%18 : memref<!tpu.dma_semaphore, #tpu.memory_space<semaphore_mem>>)
    %c2_i32 = arith.constant 2 : i32
    %19 = arith.addi %0, %c2_i32 : i32
    %20 = arith.index_cast %19 : i32 to index
    %21 = memref.load %arg1[%20] : memref<16xi32, #tpu.memory_space<smem>>
    %c0_i32_4 = arith.constant 0 : i32
    %22 = tpu.memref_slice %arg2[%21, %c0_i32_4] : memref<256x128xf32, #tpu.memory_space<any>> -> memref<1x128xf32, #tpu.memory_space<any>>
    %23 = tpu.memref_squeeze %22 : memref<1x128xf32, #tpu.memory_space<any>> -> memref<128xf32, #tpu.memory_space<any>>
    %c0_i32_5 = arith.constant 0 : i32
    %24 = tpu.memref_slice %arg5[%c2_i32, %c0_i32_5] : memref<16x128xf32, #tpu.memory_space<vmem>> -> memref<1x128xf32, #tpu.memory_space<vmem>>
    %25 = tpu.memref_squeeze %24 : memref<1x128xf32, #tpu.memory_space<vmem>> -> memref<128xf32, #tpu.memory_space<vmem>>
    %26 = tpu.memref_slice %arg6[%c2_i32] : memref<16x!tpu.dma_semaphore, #tpu.memory_space<semaphore_mem>> -> memref<1x!tpu.dma_semaphore, #tpu.memory_space<semaphore_mem>>
    %27 = tpu.memref_squeeze %26 : memref<1x!tpu.dma_semaphore, #tpu.memory_space<semaphore_mem>> -> memref<!tpu.dma_semaphore, #tpu.memory_space<semaphore_mem>>
    tpu.enqueue_dma source(%23 : memref<128xf32, #tpu.memory_space<any>>) target(%25 : memref<128xf32, #tpu.memory_space<vmem>>) target_semaphore(%27 : memref<!tpu.dma_semaphore, #tpu.memory_space<semaphore_mem>>)
    %c3_i32 = arith.constant 3 : i32
    %28 = arith.addi %0, %c3_i32 : i32
    %29 = arith.index_cast %28 : i32 to index
    %30 = memref.load %arg1[%29] : memref<16xi32, #tpu.memory_space<smem>>
    %c0_i32_6 = arith.constant 0 : i32
    %31 = tpu.memref_slice %arg2[%30, %c0_i32_6] : memref<256x128xf32, #tpu.memory_space<any>> -> memref<1x128xf32, #tpu.memory_space<any>>
    %32 = tpu.memref_squeeze %31 : memref<1x128xf32, #tpu.memory_space<any>> -> memref<128xf32, #tpu.memory_space<any>>
    %c0_i32_7 = arith.constant 0 : i32
    %33 = tpu.memref_slice %arg5[%c3_i32, %c0_i32_7] : memref<16x128xf32, #tpu.memory_space<vmem>> -> memref<1x128xf32, #tpu.memory_space<vmem>>
    %34 = tpu.memref_squeeze %33 : memref<1x128xf32, #tpu.memory_space<vmem>> -> memref<128xf32, #tpu.memory_space<vmem>>
    %35 = tpu.memref_slice %arg6[%c3_i32] : memref<16x!tpu.dma_semaphore, #tpu.memory_space<semaphore_mem>> -> memref<1x!tpu.dma_semaphore, #tpu.memory_space<semaphore_mem>>
    %36 = tpu.memref_squeeze %35 : memref<1x!tpu.dma_semaphore, #tpu.memory_space<semaphore_mem>> -> memref<!tpu.dma_semaphore, #tpu.memory_space<semaphore_mem>>
    tpu.enqueue_dma source(%32 : memref<128xf32, #tpu.memory_space<any>>) target(%34 : memref<128xf32, #tpu.memory_space<vmem>>) target_semaphore(%36 : memref<!tpu.dma_semaphore, #tpu.memory_space<semaphore_mem>>)
    %c4_i32 = arith.constant 4 : i32
    %37 = arith.addi %0, %c4_i32 : i32
    %38 = arith.index_cast %37 : i32 to index
    %39 = memref.load %arg1[%38] : memref<16xi32, #tpu.memory_space<smem>>
    %c0_i32_8 = arith.constant 0 : i32
    %40 = tpu.memref_slice %arg2[%39, %c0_i32_8] : memref<256x128xf32, #tpu.memory_space<any>> -> memref<1x128xf32, #tpu.memory_space<any>>
    %41 = tpu.memref_squeeze %40 : memref<1x128xf32, #tpu.memory_space<any>> -> memref<128xf32, #tpu.memory_space<any>>
    %c0_i32_9 = arith.constant 0 : i32
    %42 = tpu.memref_slice %arg5[%c4_i32, %c0_i32_9] : memref<16x128xf32, #tpu.memory_space<vmem>> -> memref<1x128xf32, #tpu.memory_space<vmem>>
    %43 = tpu.memref_squeeze %42 : memref<1x128xf32, #tpu.memory_space<vmem>> -> memref<128xf32, #tpu.memory_space<vmem>>
    %44 = tpu.memref_slice %arg6[%c4_i32] : memref<16x!tpu.dma_semaphore, #tpu.memory_space<semaphore_mem>> -> memref<1x!tpu.dma_semaphore, #tpu.memory_space<semaphore_mem>>
    %45 = tpu.memref_squeeze %44 : memref<1x!tpu.dma_semaphore, #tpu.memory_space<semaphore_mem>> -> memref<!tpu.dma_semaphore, #tpu.memory_space<semaphore_mem>>
    tpu.enqueue_dma source(%41 : memref<128xf32, #tpu.memory_space<any>>) target(%43 : memref<128xf32, #tpu.memory_space<vmem>>) target_semaphore(%45 : memref<!tpu.dma_semaphore, #tpu.memory_space<semaphore_mem>>)
    %c5_i32 = arith.constant 5 : i32
    %46 = arith.addi %0, %c5_i32 : i32
    %47 = arith.index_cast %46 : i32 to index
    %48 = memref.load %arg1[%47] : memref<16xi32, #tpu.memory_space<smem>>
    %c0_i32_10 = arith.constant 0 : i32
    %49 = tpu.memref_slice %arg2[%48, %c0_i32_10] : memref<256x128xf32, #tpu.memory_space<any>> -> memref<1x128xf32, #tpu.memory_space<any>>
    %50 = tpu.memref_squeeze %49 : memref<1x128xf32, #tpu.memory_space<any>> -> memref<128xf32, #tpu.memory_space<any>>
    %c0_i32_11 = arith.constant 0 : i32
    %51 = tpu.memref_slice %arg5[%c5_i32, %c0_i32_11] : memref<16x128xf32, #tpu.memory_space<vmem>> -> memref<1x128xf32, #tpu.memory_space<vmem>>
    %52 = tpu.memref_squeeze %51 : memref<1x128xf32, #tpu.memory_space<vmem>> -> memref<128xf32, #tpu.memory_space<vmem>>
    %53 = tpu.memref_slice %arg6[%c5_i32] : memref<16x!tpu.dma_semaphore, #tpu.memory_space<semaphore_mem>> -> memref<1x!tpu.dma_semaphore, #tpu.memory_space<semaphore_mem>>
    %54 = tpu.memref_squeeze %53 : memref<1x!tpu.dma_semaphore, #tpu.memory_space<semaphore_mem>> -> memref<!tpu.dma_semaphore, #tpu.memory_space<semaphore_mem>>
    tpu.enqueue_dma source(%50 : memref<128xf32, #tpu.memory_space<any>>) target(%52 : memref<128xf32, #tpu.memory_space<vmem>>) target_semaphore(%54 : memref<!tpu.dma_semaphore, #tpu.memory_space<semaphore_mem>>)
    %c6_i32 = arith.constant 6 : i32
    %55 = arith.addi %0, %c6_i32 : i32
    %56 = arith.index_cast %55 : i32 to index
    %57 = memref.load %arg1[%56] : memref<16xi32, #tpu.memory_space<smem>>
    %c0_i32_12 = arith.constant 0 : i32
    %58 = tpu.memref_slice %arg2[%57, %c0_i32_12] : memref<256x128xf32, #tpu.memory_space<any>> -> memref<1x128xf32, #tpu.memory_space<any>>
    %59 = tpu.memref_squeeze %58 : memref<1x128xf32, #tpu.memory_space<any>> -> memref<128xf32, #tpu.memory_space<any>>
    %c0_i32_13 = arith.constant 0 : i32
    %60 = tpu.memref_slice %arg5[%c6_i32, %c0_i32_13] : memref<16x128xf32, #tpu.memory_space<vmem>> -> memref<1x128xf32, #tpu.memory_space<vmem>>
    %61 = tpu.memref_squeeze %60 : memref<1x128xf32, #tpu.memory_space<vmem>> -> memref<128xf32, #tpu.memory_space<vmem>>
    %62 = tpu.memref_slice %arg6[%c6_i32] : memref<16x!tpu.dma_semaphore, #tpu.memory_space<semaphore_mem>> -> memref<1x!tpu.dma_semaphore, #tpu.memory_space<semaphore_mem>>
    %63 = tpu.memref_squeeze %62 : memref<1x!tpu.dma_semaphore, #tpu.memory_space<semaphore_mem>> -> memref<!tpu.dma_semaphore, #tpu.memory_space<semaphore_mem>>
    tpu.enqueue_dma source(%59 : memref<128xf32, #tpu.memory_space<any>>) target(%61 : memref<128xf32, #tpu.memory_space<vmem>>) target_semaphore(%63 : memref<!tpu.dma_semaphore, #tpu.memory_space<semaphore_mem>>)
    %c7_i32 = arith.constant 7 : i32
    %64 = arith.addi %0, %c7_i32 : i32
    %65 = arith.index_cast %64 : i32 to index
    %66 = memref.load %arg1[%65] : memref<16xi32, #tpu.memory_space<smem>>
    %c0_i32_14 = arith.constant 0 : i32
    %67 = tpu.memref_slice %arg2[%66, %c0_i32_14] : memref<256x128xf32, #tpu.memory_space<any>> -> memref<1x128xf32, #tpu.memory_space<any>>
    %68 = tpu.memref_squeeze %67 : memref<1x128xf32, #tpu.memory_space<any>> -> memref<128xf32, #tpu.memory_space<any>>
    %c0_i32_15 = arith.constant 0 : i32
    %69 = tpu.memref_slice %arg5[%c7_i32, %c0_i32_15] : memref<16x128xf32, #tpu.memory_space<vmem>> -> memref<1x128xf32, #tpu.memory_space<vmem>>
    %70 = tpu.memref_squeeze %69 : memref<1x128xf32, #tpu.memory_space<vmem>> -> memref<128xf32, #tpu.memory_space<vmem>>
    %71 = tpu.memref_slice %arg6[%c7_i32] : memref<16x!tpu.dma_semaphore, #tpu.memory_space<semaphore_mem>> -> memref<1x!tpu.dma_semaphore, #tpu.memory_space<semaphore_mem>>
    %72 = tpu.memref_squeeze %71 : memref<1x!tpu.dma_semaphore, #tpu.memory_space<semaphore_mem>> -> memref<!tpu.dma_semaphore, #tpu.memory_space<semaphore_mem>>
    tpu.enqueue_dma source(%68 : memref<128xf32, #tpu.memory_space<any>>) target(%70 : memref<128xf32, #tpu.memory_space<vmem>>) target_semaphore(%72 : memref<!tpu.dma_semaphore, #tpu.memory_space<semaphore_mem>>)
    %c8_i32 = arith.constant 8 : i32
    %73 = arith.addi %0, %c8_i32 : i32
    %74 = arith.index_cast %73 : i32 to index
    %75 = memref.load %arg1[%74] : memref<16xi32, #tpu.memory_space<smem>>
    %c0_i32_16 = arith.constant 0 : i32
    %76 = tpu.memref_slice %arg2[%75, %c0_i32_16] : memref<256x128xf32, #tpu.memory_space<any>> -> memref<1x128xf32, #tpu.memory_space<any>>
    %77 = tpu.memref_squeeze %76 : memref<1x128xf32, #tpu.memory_space<any>> -> memref<128xf32, #tpu.memory_space<any>>
    %c0_i32_17 = arith.constant 0 : i32
    %78 = tpu.memref_slice %arg5[%c8_i32, %c0_i32_17] : memref<16x128xf32, #tpu.memory_space<vmem>> -> memref<1x128xf32, #tpu.memory_space<vmem>>
    %79 = tpu.memref_squeeze %78 : memref<1x128xf32, #tpu.memory_space<vmem>> -> memref<128xf32, #tpu.memory_space<vmem>>
    %80 = tpu.memref_slice %arg6[%c8_i32] : memref<16x!tpu.dma_semaphore, #tpu.memory_space<semaphore_mem>> -> memref<1x!tpu.dma_semaphore, #tpu.memory_space<semaphore_mem>>
    %81 = tpu.memref_squeeze %80 : memref<1x!tpu.dma_semaphore, #tpu.memory_space<semaphore_mem>> -> memref<!tpu.dma_semaphore, #tpu.memory_space<semaphore_mem>>
    tpu.enqueue_dma source(%77 : memref<128xf32, #tpu.memory_space<any>>) target(%79 : memref<128xf32, #tpu.memory_space<vmem>>) target_semaphore(%81 : memref<!tpu.dma_semaphore, #tpu.memory_space<semaphore_mem>>)
    %c9_i32 = arith.constant 9 : i32
    %82 = arith.addi %0, %c9_i32 : i32
    %83 = arith.index_cast %82 : i32 to index
    %84 = memref.load %arg1[%83] : memref<16xi32, #tpu.memory_space<smem>>
    %c0_i32_18 = arith.constant 0 : i32
    %85 = tpu.memref_slice %arg2[%84, %c0_i32_18] : memref<256x128xf32, #tpu.memory_space<any>> -> memref<1x128xf32, #tpu.memory_space<any>>
    %86 = tpu.memref_squeeze %85 : memref<1x128xf32, #tpu.memory_space<any>> -> memref<128xf32, #tpu.memory_space<any>>
    %c0_i32_19 = arith.constant 0 : i32
    %87 = tpu.memref_slice %arg5[%c9_i32, %c0_i32_19] : memref<16x128xf32, #tpu.memory_space<vmem>> -> memref<1x128xf32, #tpu.memory_space<vmem>>
    %88 = tpu.memref_squeeze %87 : memref<1x128xf32, #tpu.memory_space<vmem>> -> memref<128xf32, #tpu.memory_space<vmem>>
    %89 = tpu.memref_slice %arg6[%c9_i32] : memref<16x!tpu.dma_semaphore, #tpu.memory_space<semaphore_mem>> -> memref<1x!tpu.dma_semaphore, #tpu.memory_space<semaphore_mem>>
    %90 = tpu.memref_squeeze %89 : memref<1x!tpu.dma_semaphore, #tpu.memory_space<semaphore_mem>> -> memref<!tpu.dma_semaphore, #tpu.memory_space<semaphore_mem>>
    tpu.enqueue_dma source(%86 : memref<128xf32, #tpu.memory_space<any>>) target(%88 : memref<128xf32, #tpu.memory_space<vmem>>) target_semaphore(%90 : memref<!tpu.dma_semaphore, #tpu.memory_space<semaphore_mem>>)
    %c10_i32 = arith.constant 10 : i32
    %91 = arith.addi %0, %c10_i32 : i32
    %92 = arith.index_cast %91 : i32 to index
    %93 = memref.load %arg1[%92] : memref<16xi32, #tpu.memory_space<smem>>
    %c0_i32_20 = arith.constant 0 : i32
    %94 = tpu.memref_slice %arg2[%93, %c0_i32_20] : memref<256x128xf32, #tpu.memory_space<any>> -> memref<1x128xf32, #tpu.memory_space<any>>
    %95 = tpu.memref_squeeze %94 : memref<1x128xf32, #tpu.memory_space<any>> -> memref<128xf32, #tpu.memory_space<any>>
    %c0_i32_21 = arith.constant 0 : i32
    %96 = tpu.memref_slice %arg5[%c10_i32, %c0_i32_21] : memref<16x128xf32, #tpu.memory_space<vmem>> -> memref<1x128xf32, #tpu.memory_space<vmem>>
    %97 = tpu.memref_squeeze %96 : memref<1x128xf32, #tpu.memory_space<vmem>> -> memref<128xf32, #tpu.memory_space<vmem>>
    %98 = tpu.memref_slice %arg6[%c10_i32] : memref<16x!tpu.dma_semaphore, #tpu.memory_space<semaphore_mem>> -> memref<1x!tpu.dma_semaphore, #tpu.memory_space<semaphore_mem>>
    %99 = tpu.memref_squeeze %98 : memref<1x!tpu.dma_semaphore, #tpu.memory_space<semaphore_mem>> -> memref<!tpu.dma_semaphore, #tpu.memory_space<semaphore_mem>>
    tpu.enqueue_dma source(%95 : memref<128xf32, #tpu.memory_space<any>>) target(%97 : memref<128xf32, #tpu.memory_space<vmem>>) target_semaphore(%99 : memref<!tpu.dma_semaphore, #tpu.memory_space<semaphore_mem>>)
    %c11_i32 = arith.constant 11 : i32
    %100 = arith.addi %0, %c11_i32 : i32
    %101 = arith.index_cast %100 : i32 to index
    %102 = memref.load %arg1[%101] : memref<16xi32, #tpu.memory_space<smem>>
    %c0_i32_22 = arith.constant 0 : i32
    %103 = tpu.memref_slice %arg2[%102, %c0_i32_22] : memref<256x128xf32, #tpu.memory_space<any>> -> memref<1x128xf32, #tpu.memory_space<any>>
    %104 = tpu.memref_squeeze %103 : memref<1x128xf32, #tpu.memory_space<any>> -> memref<128xf32, #tpu.memory_space<any>>
    %c0_i32_23 = arith.constant 0 : i32
    %105 = tpu.memref_slice %arg5[%c11_i32, %c0_i32_23] : memref<16x128xf32, #tpu.memory_space<vmem>> -> memref<1x128xf32, #tpu.memory_space<vmem>>
    %106 = tpu.memref_squeeze %105 : memref<1x128xf32, #tpu.memory_space<vmem>> -> memref<128xf32, #tpu.memory_space<vmem>>
    %107 = tpu.memref_slice %arg6[%c11_i32] : memref<16x!tpu.dma_semaphore, #tpu.memory_space<semaphore_mem>> -> memref<1x!tpu.dma_semaphore, #tpu.memory_space<semaphore_mem>>
    %108 = tpu.memref_squeeze %107 : memref<1x!tpu.dma_semaphore, #tpu.memory_space<semaphore_mem>> -> memref<!tpu.dma_semaphore, #tpu.memory_space<semaphore_mem>>
    tpu.enqueue_dma source(%104 : memref<128xf32, #tpu.memory_space<any>>) target(%106 : memref<128xf32, #tpu.memory_space<vmem>>) target_semaphore(%108 : memref<!tpu.dma_semaphore, #tpu.memory_space<semaphore_mem>>)
    %c12_i32 = arith.constant 12 : i32
    %109 = arith.addi %0, %c12_i32 : i32
    %110 = arith.index_cast %109 : i32 to index
    %111 = memref.load %arg1[%110] : memref<16xi32, #tpu.memory_space<smem>>
    %c0_i32_24 = arith.constant 0 : i32
    %112 = tpu.memref_slice %arg2[%111, %c0_i32_24] : memref<256x128xf32, #tpu.memory_space<any>> -> memref<1x128xf32, #tpu.memory_space<any>>
    %113 = tpu.memref_squeeze %112 : memref<1x128xf32, #tpu.memory_space<any>> -> memref<128xf32, #tpu.memory_space<any>>
    %c0_i32_25 = arith.constant 0 : i32
    %114 = tpu.memref_slice %arg5[%c12_i32, %c0_i32_25] : memref<16x128xf32, #tpu.memory_space<vmem>> -> memref<1x128xf32, #tpu.memory_space<vmem>>
    %115 = tpu.memref_squeeze %114 : memref<1x128xf32, #tpu.memory_space<vmem>> -> memref<128xf32, #tpu.memory_space<vmem>>
    %116 = tpu.memref_slice %arg6[%c12_i32] : memref<16x!tpu.dma_semaphore, #tpu.memory_space<semaphore_mem>> -> memref<1x!tpu.dma_semaphore, #tpu.memory_space<semaphore_mem>>
    %117 = tpu.memref_squeeze %116 : memref<1x!tpu.dma_semaphore, #tpu.memory_space<semaphore_mem>> -> memref<!tpu.dma_semaphore, #tpu.memory_space<semaphore_mem>>
    tpu.enqueue_dma source(%113 : memref<128xf32, #tpu.memory_space<any>>) target(%115 : memref<128xf32, #tpu.memory_space<vmem>>) target_semaphore(%117 : memref<!tpu.dma_semaphore, #tpu.memory_space<semaphore_mem>>)
    %c13_i32 = arith.constant 13 : i32
    %118 = arith.addi %0, %c13_i32 : i32
    %119 = arith.index_cast %118 : i32 to index
    %120 = memref.load %arg1[%119] : memref<16xi32, #tpu.memory_space<smem>>
    %c0_i32_26 = arith.constant 0 : i32
    %121 = tpu.memref_slice %arg2[%120, %c0_i32_26] : memref<256x128xf32, #tpu.memory_space<any>> -> memref<1x128xf32, #tpu.memory_space<any>>
    %122 = tpu.memref_squeeze %121 : memref<1x128xf32, #tpu.memory_space<any>> -> memref<128xf32, #tpu.memory_space<any>>
    %c0_i32_27 = arith.constant 0 : i32
    %123 = tpu.memref_slice %arg5[%c13_i32, %c0_i32_27] : memref<16x128xf32, #tpu.memory_space<vmem>> -> memref<1x128xf32, #tpu.memory_space<vmem>>
    %124 = tpu.memref_squeeze %123 : memref<1x128xf32, #tpu.memory_space<vmem>> -> memref<128xf32, #tpu.memory_space<vmem>>
    %125 = tpu.memref_slice %arg6[%c13_i32] : memref<16x!tpu.dma_semaphore, #tpu.memory_space<semaphore_mem>> -> memref<1x!tpu.dma_semaphore, #tpu.memory_space<semaphore_mem>>
    %126 = tpu.memref_squeeze %125 : memref<1x!tpu.dma_semaphore, #tpu.memory_space<semaphore_mem>> -> memref<!tpu.dma_semaphore, #tpu.memory_space<semaphore_mem>>
    tpu.enqueue_dma source(%122 : memref<128xf32, #tpu.memory_space<any>>) target(%124 : memref<128xf32, #tpu.memory_space<vmem>>) target_semaphore(%126 : memref<!tpu.dma_semaphore, #tpu.memory_space<semaphore_mem>>)
    %c14_i32 = arith.constant 14 : i32
    %127 = arith.addi %0, %c14_i32 : i32
    %128 = arith.index_cast %127 : i32 to index
    %129 = memref.load %arg1[%128] : memref<16xi32, #tpu.memory_space<smem>>
    %c0_i32_28 = arith.constant 0 : i32
    %130 = tpu.memref_slice %arg2[%129, %c0_i32_28] : memref<256x128xf32, #tpu.memory_space<any>> -> memref<1x128xf32, #tpu.memory_space<any>>
    %131 = tpu.memref_squeeze %130 : memref<1x128xf32, #tpu.memory_space<any>> -> memref<128xf32, #tpu.memory_space<any>>
    %c0_i32_29 = arith.constant 0 : i32
    %132 = tpu.memref_slice %arg5[%c14_i32, %c0_i32_29] : memref<16x128xf32, #tpu.memory_space<vmem>> -> memref<1x128xf32, #tpu.memory_space<vmem>>
    %133 = tpu.memref_squeeze %132 : memref<1x128xf32, #tpu.memory_space<vmem>> -> memref<128xf32, #tpu.memory_space<vmem>>
    %134 = tpu.memref_slice %arg6[%c14_i32] : memref<16x!tpu.dma_semaphore, #tpu.memory_space<semaphore_mem>> -> memref<1x!tpu.dma_semaphore, #tpu.memory_space<semaphore_mem>>
    %135 = tpu.memref_squeeze %134 : memref<1x!tpu.dma_semaphore, #tpu.memory_space<semaphore_mem>> -> memref<!tpu.dma_semaphore, #tpu.memory_space<semaphore_mem>>
    tpu.enqueue_dma source(%131 : memref<128xf32, #tpu.memory_space<any>>) target(%133 : memref<128xf32, #tpu.memory_space<vmem>>) target_semaphore(%135 : memref<!tpu.dma_semaphore, #tpu.memory_space<semaphore_mem>>)
    %c15_i32 = arith.constant 15 : i32
    %136 = arith.addi %0, %c15_i32 : i32
    %137 = arith.index_cast %136 : i32 to index
    %138 = memref.load %arg1[%137] : memref<16xi32, #tpu.memory_space<smem>>
    %c0_i32_30 = arith.constant 0 : i32
    %139 = tpu.memref_slice %arg2[%138, %c0_i32_30] : memref<256x128xf32, #tpu.memory_space<any>> -> memref<1x128xf32, #tpu.memory_space<any>>
    %140 = tpu.memref_squeeze %139 : memref<1x128xf32, #tpu.memory_space<any>> -> memref<128xf32, #tpu.memory_space<any>>
    %c0_i32_31 = arith.constant 0 : i32
    %141 = tpu.memref_slice %arg5[%c15_i32, %c0_i32_31] : memref<16x128xf32, #tpu.memory_space<vmem>> -> memref<1x128xf32, #tpu.memory_space<vmem>>
    %142 = tpu.memref_squeeze %141 : memref<1x128xf32, #tpu.memory_space<vmem>> -> memref<128xf32, #tpu.memory_space<vmem>>
    %143 = tpu.memref_slice %arg6[%c15_i32] : memref<16x!tpu.dma_semaphore, #tpu.memory_space<semaphore_mem>> -> memref<1x!tpu.dma_semaphore, #tpu.memory_space<semaphore_mem>>
    %144 = tpu.memref_squeeze %143 : memref<1x!tpu.dma_semaphore, #tpu.memory_space<semaphore_mem>> -> memref<!tpu.dma_semaphore, #tpu.memory_space<semaphore_mem>>
    tpu.enqueue_dma source(%140 : memref<128xf32, #tpu.memory_space<any>>) target(%142 : memref<128xf32, #tpu.memory_space<vmem>>) target_semaphore(%144 : memref<!tpu.dma_semaphore, #tpu.memory_space<semaphore_mem>>)
    %c16_i32_32 = arith.constant 16 : i32
    %c0 = arith.constant 0 : index
    %c0_33 = arith.constant 0 : index
    %145 = vector.load %arg3[%c0, %c0_33] : memref<1x128xf32, #tpu.memory_space<vmem>>, vector<1x128xf32>
    %c0_i32_34 = arith.constant 0 : i32
    %c8_i32_35 = arith.constant 8 : i32
    %146 = arith.muli %c0_i32_34, %c8_i32_35 : i32
    %147 = tpu.assume_multiple %146, 8 : i32
    %c0_i32_36 = arith.constant 0 : i32
    %148 = arith.addi %147, %c0_i32_36 : i32
    %149 = arith.addi %147, %c0_i32_36 : i32
    %c0_i32_37 = arith.constant 0 : i32
    %c0_i32_38 = arith.constant 0 : i32
    %150 = tpu.memref_slice %arg2[%c0_i32_37, %c0_i32_38] : memref<256x128xf32, #tpu.memory_space<any>> -> memref<1x128xf32, #tpu.memory_space<any>>
    %151 = tpu.memref_squeeze %150 : memref<1x128xf32, #tpu.memory_space<any>> -> memref<128xf32, #tpu.memory_space<any>>
    %c0_i32_39 = arith.constant 0 : i32
    %152 = tpu.memref_slice %arg5[%148, %c0_i32_39] : memref<16x128xf32, #tpu.memory_space<vmem>> -> memref<1x128xf32, #tpu.memory_space<vmem>>
    %153 = tpu.memref_squeeze %152 : memref<1x128xf32, #tpu.memory_space<vmem>> -> memref<128xf32, #tpu.memory_space<vmem>>
    %154 = tpu.memref_slice %arg6[%149] : memref<16x!tpu.dma_semaphore, #tpu.memory_space<semaphore_mem>> -> memref<1x!tpu.dma_semaphore, #tpu.memory_space<semaphore_mem>>
    %155 = tpu.memref_squeeze %154 : memref<1x!tpu.dma_semaphore, #tpu.memory_space<semaphore_mem>> -> memref<!tpu.dma_semaphore, #tpu.memory_space<semaphore_mem>>
    tpu.wait_dma2 semaphore(%155 : memref<!tpu.dma_semaphore, #tpu.memory_space<semaphore_mem>>) src(%151 : memref<128xf32, #tpu.memory_space<any>>) dst(%153 : memref<128xf32, #tpu.memory_space<vmem>>)
    %c1_i32_40 = arith.constant 1 : i32
    %156 = arith.addi %147, %c1_i32_40 : i32
    %157 = arith.addi %147, %c1_i32_40 : i32
    %c0_i32_41 = arith.constant 0 : i32
    %c0_i32_42 = arith.constant 0 : i32
    %158 = tpu.memref_slice %arg2[%c0_i32_41, %c0_i32_42] : memref<256x128xf32, #tpu.memory_space<any>> -> memref<1x128xf32, #tpu.memory_space<any>>
    %159 = tpu.memref_squeeze %158 : memref<1x128xf32, #tpu.memory_space<any>> -> memref<128xf32, #tpu.memory_space<any>>
    %c0_i32_43 = arith.constant 0 : i32
    %160 = tpu.memref_slice %arg5[%156, %c0_i32_43] : memref<16x128xf32, #tpu.memory_space<vmem>> -> memref<1x128xf32, #tpu.memory_space<vmem>>
    %161 = tpu.memref_squeeze %160 : memref<1x128xf32, #tpu.memory_space<vmem>> -> memref<128xf32, #tpu.memory_space<vmem>>
    %162 = tpu.memref_slice %arg6[%157] : memref<16x!tpu.dma_semaphore, #tpu.memory_space<semaphore_mem>> -> memref<1x!tpu.dma_semaphore, #tpu.memory_space<semaphore_mem>>
    %163 = tpu.memref_squeeze %162 : memref<1x!tpu.dma_semaphore, #tpu.memory_space<semaphore_mem>> -> memref<!tpu.dma_semaphore, #tpu.memory_space<semaphore_mem>>
    tpu.wait_dma2 semaphore(%163 : memref<!tpu.dma_semaphore, #tpu.memory_space<semaphore_mem>>) src(%159 : memref<128xf32, #tpu.memory_space<any>>) dst(%161 : memref<128xf32, #tpu.memory_space<vmem>>)
    %c2_i32_44 = arith.constant 2 : i32
    %164 = arith.addi %147, %c2_i32_44 : i32
    %165 = arith.addi %147, %c2_i32_44 : i32
    %c0_i32_45 = arith.constant 0 : i32
    %c0_i32_46 = arith.constant 0 : i32
    %166 = tpu.memref_slice %arg2[%c0_i32_45, %c0_i32_46] : memref<256x128xf32, #tpu.memory_space<any>> -> memref<1x128xf32, #tpu.memory_space<any>>
    %167 = tpu.memref_squeeze %166 : memref<1x128xf32, #tpu.memory_space<any>> -> memref<128xf32, #tpu.memory_space<any>>
    %c0_i32_47 = arith.constant 0 : i32
    %168 = tpu.memref_slice %arg5[%164, %c0_i32_47] : memref<16x128xf32, #tpu.memory_space<vmem>> -> memref<1x128xf32, #tpu.memory_space<vmem>>
    %169 = tpu.memref_squeeze %168 : memref<1x128xf32, #tpu.memory_space<vmem>> -> memref<128xf32, #tpu.memory_space<vmem>>
    %170 = tpu.memref_slice %arg6[%165] : memref<16x!tpu.dma_semaphore, #tpu.memory_space<semaphore_mem>> -> memref<1x!tpu.dma_semaphore, #tpu.memory_space<semaphore_mem>>
    %171 = tpu.memref_squeeze %170 : memref<1x!tpu.dma_semaphore, #tpu.memory_space<semaphore_mem>> -> memref<!tpu.dma_semaphore, #tpu.memory_space<semaphore_mem>>
    tpu.wait_dma2 semaphore(%171 : memref<!tpu.dma_semaphore, #tpu.memory_space<semaphore_mem>>) src(%167 : memref<128xf32, #tpu.memory_space<any>>) dst(%169 : memref<128xf32, #tpu.memory_space<vmem>>)
    %c3_i32_48 = arith.constant 3 : i32
    %172 = arith.addi %147, %c3_i32_48 : i32
    %173 = arith.addi %147, %c3_i32_48 : i32
    %c0_i32_49 = arith.constant 0 : i32
    %c0_i32_50 = arith.constant 0 : i32
    %174 = tpu.memref_slice %arg2[%c0_i32_49, %c0_i32_50] : memref<256x128xf32, #tpu.memory_space<any>> -> memref<1x128xf32, #tpu.memory_space<any>>
    %175 = tpu.memref_squeeze %174 : memref<1x128xf32, #tpu.memory_space<any>> -> memref<128xf32, #tpu.memory_space<any>>
    %c0_i32_51 = arith.constant 0 : i32
    %176 = tpu.memref_slice %arg5[%172, %c0_i32_51] : memref<16x128xf32, #tpu.memory_space<vmem>> -> memref<1x128xf32, #tpu.memory_space<vmem>>
    %177 = tpu.memref_squeeze %176 : memref<1x128xf32, #tpu.memory_space<vmem>> -> memref<128xf32, #tpu.memory_space<vmem>>
    %178 = tpu.memref_slice %arg6[%173] : memref<16x!tpu.dma_semaphore, #tpu.memory_space<semaphore_mem>> -> memref<1x!tpu.dma_semaphore, #tpu.memory_space<semaphore_mem>>
    %179 = tpu.memref_squeeze %178 : memref<1x!tpu.dma_semaphore, #tpu.memory_space<semaphore_mem>> -> memref<!tpu.dma_semaphore, #tpu.memory_space<semaphore_mem>>
    tpu.wait_dma2 semaphore(%179 : memref<!tpu.dma_semaphore, #tpu.memory_space<semaphore_mem>>) src(%175 : memref<128xf32, #tpu.memory_space<any>>) dst(%177 : memref<128xf32, #tpu.memory_space<vmem>>)
    %c4_i32_52 = arith.constant 4 : i32
    %180 = arith.addi %147, %c4_i32_52 : i32
    %181 = arith.addi %147, %c4_i32_52 : i32
    %c0_i32_53 = arith.constant 0 : i32
    %c0_i32_54 = arith.constant 0 : i32
    %182 = tpu.memref_slice %arg2[%c0_i32_53, %c0_i32_54] : memref<256x128xf32, #tpu.memory_space<any>> -> memref<1x128xf32, #tpu.memory_space<any>>
    %183 = tpu.memref_squeeze %182 : memref<1x128xf32, #tpu.memory_space<any>> -> memref<128xf32, #tpu.memory_space<any>>
    %c0_i32_55 = arith.constant 0 : i32
    %184 = tpu.memref_slice %arg5[%180, %c0_i32_55] : memref<16x128xf32, #tpu.memory_space<vmem>> -> memref<1x128xf32, #tpu.memory_space<vmem>>
    %185 = tpu.memref_squeeze %184 : memref<1x128xf32, #tpu.memory_space<vmem>> -> memref<128xf32, #tpu.memory_space<vmem>>
    %186 = tpu.memref_slice %arg6[%181] : memref<16x!tpu.dma_semaphore, #tpu.memory_space<semaphore_mem>> -> memref<1x!tpu.dma_semaphore, #tpu.memory_space<semaphore_mem>>
    %187 = tpu.memref_squeeze %186 : memref<1x!tpu.dma_semaphore, #tpu.memory_space<semaphore_mem>> -> memref<!tpu.dma_semaphore, #tpu.memory_space<semaphore_mem>>
    tpu.wait_dma2 semaphore(%187 : memref<!tpu.dma_semaphore, #tpu.memory_space<semaphore_mem>>) src(%183 : memref<128xf32, #tpu.memory_space<any>>) dst(%185 : memref<128xf32, #tpu.memory_space<vmem>>)
    %c5_i32_56 = arith.constant 5 : i32
    %188 = arith.addi %147, %c5_i32_56 : i32
    %189 = arith.addi %147, %c5_i32_56 : i32
    %c0_i32_57 = arith.constant 0 : i32
    %c0_i32_58 = arith.constant 0 : i32
    %190 = tpu.memref_slice %arg2[%c0_i32_57, %c0_i32_58] : memref<256x128xf32, #tpu.memory_space<any>> -> memref<1x128xf32, #tpu.memory_space<any>>
    %191 = tpu.memref_squeeze %190 : memref<1x128xf32, #tpu.memory_space<any>> -> memref<128xf32, #tpu.memory_space<any>>
    %c0_i32_59 = arith.constant 0 : i32
    %192 = tpu.memref_slice %arg5[%188, %c0_i32_59] : memref<16x128xf32, #tpu.memory_space<vmem>> -> memref<1x128xf32, #tpu.memory_space<vmem>>
    %193 = tpu.memref_squeeze %192 : memref<1x128xf32, #tpu.memory_space<vmem>> -> memref<128xf32, #tpu.memory_space<vmem>>
    %194 = tpu.memref_slice %arg6[%189] : memref<16x!tpu.dma_semaphore, #tpu.memory_space<semaphore_mem>> -> memref<1x!tpu.dma_semaphore, #tpu.memory_space<semaphore_mem>>
    %195 = tpu.memref_squeeze %194 : memref<1x!tpu.dma_semaphore, #tpu.memory_space<semaphore_mem>> -> memref<!tpu.dma_semaphore, #tpu.memory_space<semaphore_mem>>
    tpu.wait_dma2 semaphore(%195 : memref<!tpu.dma_semaphore, #tpu.memory_space<semaphore_mem>>) src(%191 : memref<128xf32, #tpu.memory_space<any>>) dst(%193 : memref<128xf32, #tpu.memory_space<vmem>>)
    %c6_i32_60 = arith.constant 6 : i32
    %196 = arith.addi %147, %c6_i32_60 : i32
    %197 = arith.addi %147, %c6_i32_60 : i32
    %c0_i32_61 = arith.constant 0 : i32
    %c0_i32_62 = arith.constant 0 : i32
    %198 = tpu.memref_slice %arg2[%c0_i32_61, %c0_i32_62] : memref<256x128xf32, #tpu.memory_space<any>> -> memref<1x128xf32, #tpu.memory_space<any>>
    %199 = tpu.memref_squeeze %198 : memref<1x128xf32, #tpu.memory_space<any>> -> memref<128xf32, #tpu.memory_space<any>>
    %c0_i32_63 = arith.constant 0 : i32
    %200 = tpu.memref_slice %arg5[%196, %c0_i32_63] : memref<16x128xf32, #tpu.memory_space<vmem>> -> memref<1x128xf32, #tpu.memory_space<vmem>>
    %201 = tpu.memref_squeeze %200 : memref<1x128xf32, #tpu.memory_space<vmem>> -> memref<128xf32, #tpu.memory_space<vmem>>
    %202 = tpu.memref_slice %arg6[%197] : memref<16x!tpu.dma_semaphore, #tpu.memory_space<semaphore_mem>> -> memref<1x!tpu.dma_semaphore, #tpu.memory_space<semaphore_mem>>
    %203 = tpu.memref_squeeze %202 : memref<1x!tpu.dma_semaphore, #tpu.memory_space<semaphore_mem>> -> memref<!tpu.dma_semaphore, #tpu.memory_space<semaphore_mem>>
    tpu.wait_dma2 semaphore(%203 : memref<!tpu.dma_semaphore, #tpu.memory_space<semaphore_mem>>) src(%199 : memref<128xf32, #tpu.memory_space<any>>) dst(%201 : memref<128xf32, #tpu.memory_space<vmem>>)
    %c7_i32_64 = arith.constant 7 : i32
    %204 = arith.addi %147, %c7_i32_64 : i32
    %205 = arith.addi %147, %c7_i32_64 : i32
    %c0_i32_65 = arith.constant 0 : i32
    %c0_i32_66 = arith.constant 0 : i32
    %206 = tpu.memref_slice %arg2[%c0_i32_65, %c0_i32_66] : memref<256x128xf32, #tpu.memory_space<any>> -> memref<1x128xf32, #tpu.memory_space<any>>
    %207 = tpu.memref_squeeze %206 : memref<1x128xf32, #tpu.memory_space<any>> -> memref<128xf32, #tpu.memory_space<any>>
    %c0_i32_67 = arith.constant 0 : i32
    %208 = tpu.memref_slice %arg5[%204, %c0_i32_67] : memref<16x128xf32, #tpu.memory_space<vmem>> -> memref<1x128xf32, #tpu.memory_space<vmem>>
    %209 = tpu.memref_squeeze %208 : memref<1x128xf32, #tpu.memory_space<vmem>> -> memref<128xf32, #tpu.memory_space<vmem>>
    %210 = tpu.memref_slice %arg6[%205] : memref<16x!tpu.dma_semaphore, #tpu.memory_space<semaphore_mem>> -> memref<1x!tpu.dma_semaphore, #tpu.memory_space<semaphore_mem>>
    %211 = tpu.memref_squeeze %210 : memref<1x!tpu.dma_semaphore, #tpu.memory_space<semaphore_mem>> -> memref<!tpu.dma_semaphore, #tpu.memory_space<semaphore_mem>>
    tpu.wait_dma2 semaphore(%211 : memref<!tpu.dma_semaphore, #tpu.memory_space<semaphore_mem>>) src(%207 : memref<128xf32, #tpu.memory_space<any>>) dst(%209 : memref<128xf32, #tpu.memory_space<vmem>>)
    %c8_i32_68 = arith.constant 8 : i32
    %212 = arith.index_cast %147 : i32 to index
    %c0_69 = arith.constant 0 : index
    %213 = vector.load %arg5[%212, %c0_69] : memref<16x128xf32, #tpu.memory_space<vmem>>, vector<8x128xf32>
    %214 = vector.broadcast %145 : vector<1x128xf32> to vector<8x128xf32>
    %215 = arith.addf %213, %214 : vector<8x128xf32>
    %216 = arith.index_cast %147 : i32 to index
    %c0_70 = arith.constant 0 : index
    %217 = vector.load %arg4[%216, %c0_70] : memref<16x128xf32, #tpu.memory_space<vmem>>, vector<8x128xf32>
    tpu.vector_store %arg4[%216, %c0_70], %215 {strides = array<i32>} : memref<16x128xf32, #tpu.memory_space<vmem>>, vector<8x128xf32>,
    %c1_i32_71 = arith.constant 1 : i32
    %c8_i32_72 = arith.constant 8 : i32
    %218 = arith.muli %c1_i32_71, %c8_i32_72 : i32
    %219 = tpu.assume_multiple %218, 8 : i32
    %c0_i32_73 = arith.constant 0 : i32
    %220 = arith.addi %219, %c0_i32_73 : i32
    %221 = arith.addi %219, %c0_i32_73 : i32
    %c0_i32_74 = arith.constant 0 : i32
    %c0_i32_75 = arith.constant 0 : i32
    %222 = tpu.memref_slice %arg2[%c0_i32_74, %c0_i32_75] : memref<256x128xf32, #tpu.memory_space<any>> -> memref<1x128xf32, #tpu.memory_space<any>>
    %223 = tpu.memref_squeeze %222 : memref<1x128xf32, #tpu.memory_space<any>> -> memref<128xf32, #tpu.memory_space<any>>
    %c0_i32_76 = arith.constant 0 : i32
    %224 = tpu.memref_slice %arg5[%220, %c0_i32_76] : memref<16x128xf32, #tpu.memory_space<vmem>> -> memref<1x128xf32, #tpu.memory_space<vmem>>
    %225 = tpu.memref_squeeze %224 : memref<1x128xf32, #tpu.memory_space<vmem>> -> memref<128xf32, #tpu.memory_space<vmem>>
    %226 = tpu.memref_slice %arg6[%221] : memref<16x!tpu.dma_semaphore, #tpu.memory_space<semaphore_mem>> -> memref<1x!tpu.dma_semaphore, #tpu.memory_space<semaphore_mem>>
    %227 = tpu.memref_squeeze %226 : memref<1x!tpu.dma_semaphore, #tpu.memory_space<semaphore_mem>> -> memref<!tpu.dma_semaphore, #tpu.memory_space<semaphore_mem>>
    tpu.wait_dma2 semaphore(%227 : memref<!tpu.dma_semaphore, #tpu.memory_space<semaphore_mem>>) src(%223 : memref<128xf32, #tpu.memory_space<any>>) dst(%225 : memref<128xf32, #tpu.memory_space<vmem>>)
    %c1_i32_77 = arith.constant 1 : i32
    %228 = arith.addi %219, %c1_i32_77 : i32
    %229 = arith.addi %219, %c1_i32_77 : i32
    %c0_i32_78 = arith.constant 0 : i32
    %c0_i32_79 = arith.constant 0 : i32
    %230 = tpu.memref_slice %arg2[%c0_i32_78, %c0_i32_79] : memref<256x128xf32, #tpu.memory_space<any>> -> memref<1x128xf32, #tpu.memory_space<any>>
    %231 = tpu.memref_squeeze %230 : memref<1x128xf32, #tpu.memory_space<any>> -> memref<128xf32, #tpu.memory_space<any>>
    %c0_i32_80 = arith.constant 0 : i32
    %232 = tpu.memref_slice %arg5[%228, %c0_i32_80] : memref<16x128xf32, #tpu.memory_space<vmem>> -> memref<1x128xf32, #tpu.memory_space<vmem>>
    %233 = tpu.memref_squeeze %232 : memref<1x128xf32, #tpu.memory_space<vmem>> -> memref<128xf32, #tpu.memory_space<vmem>>
    %234 = tpu.memref_slice %arg6[%229] : memref<16x!tpu.dma_semaphore, #tpu.memory_space<semaphore_mem>> -> memref<1x!tpu.dma_semaphore, #tpu.memory_space<semaphore_mem>>
    %235 = tpu.memref_squeeze %234 : memref<1x!tpu.dma_semaphore, #tpu.memory_space<semaphore_mem>> -> memref<!tpu.dma_semaphore, #tpu.memory_space<semaphore_mem>>
    tpu.wait_dma2 semaphore(%235 : memref<!tpu.dma_semaphore, #tpu.memory_space<semaphore_mem>>) src(%231 : memref<128xf32, #tpu.memory_space<any>>) dst(%233 : memref<128xf32, #tpu.memory_space<vmem>>)
    %c2_i32_81 = arith.constant 2 : i32
    %236 = arith.addi %219, %c2_i32_81 : i32
    %237 = arith.addi %219, %c2_i32_81 : i32
    %c0_i32_82 = arith.constant 0 : i32
    %c0_i32_83 = arith.constant 0 : i32
    %238 = tpu.memref_slice %arg2[%c0_i32_82, %c0_i32_83] : memref<256x128xf32, #tpu.memory_space<any>> -> memref<1x128xf32, #tpu.memory_space<any>>
    %239 = tpu.memref_squeeze %238 : memref<1x128xf32, #tpu.memory_space<any>> -> memref<128xf32, #tpu.memory_space<any>>
    %c0_i32_84 = arith.constant 0 : i32
    %240 = tpu.memref_slice %arg5[%236, %c0_i32_84] : memref<16x128xf32, #tpu.memory_space<vmem>> -> memref<1x128xf32, #tpu.memory_space<vmem>>
    %241 = tpu.memref_squeeze %240 : memref<1x128xf32, #tpu.memory_space<vmem>> -> memref<128xf32, #tpu.memory_space<vmem>>
    %242 = tpu.memref_slice %arg6[%237] : memref<16x!tpu.dma_semaphore, #tpu.memory_space<semaphore_mem>> -> memref<1x!tpu.dma_semaphore, #tpu.memory_space<semaphore_mem>>
    %243 = tpu.memref_squeeze %242 : memref<1x!tpu.dma_semaphore, #tpu.memory_space<semaphore_mem>> -> memref<!tpu.dma_semaphore, #tpu.memory_space<semaphore_mem>>
    tpu.wait_dma2 semaphore(%243 : memref<!tpu.dma_semaphore, #tpu.memory_space<semaphore_mem>>) src(%239 : memref<128xf32, #tpu.memory_space<any>>) dst(%241 : memref<128xf32, #tpu.memory_space<vmem>>)
    %c3_i32_85 = arith.constant 3 : i32
    %244 = arith.addi %219, %c3_i32_85 : i32
    %245 = arith.addi %219, %c3_i32_85 : i32
    %c0_i32_86 = arith.constant 0 : i32
    %c0_i32_87 = arith.constant 0 : i32
    %246 = tpu.memref_slice %arg2[%c0_i32_86, %c0_i32_87] : memref<256x128xf32, #tpu.memory_space<any>> -> memref<1x128xf32, #tpu.memory_space<any>>
    %247 = tpu.memref_squeeze %246 : memref<1x128xf32, #tpu.memory_space<any>> -> memref<128xf32, #tpu.memory_space<any>>
    %c0_i32_88 = arith.constant 0 : i32
    %248 = tpu.memref_slice %arg5[%244, %c0_i32_88] : memref<16x128xf32, #tpu.memory_space<vmem>> -> memref<1x128xf32, #tpu.memory_space<vmem>>
    %249 = tpu.memref_squeeze %248 : memref<1x128xf32, #tpu.memory_space<vmem>> -> memref<128xf32, #tpu.memory_space<vmem>>
    %250 = tpu.memref_slice %arg6[%245] : memref<16x!tpu.dma_semaphore, #tpu.memory_space<semaphore_mem>> -> memref<1x!tpu.dma_semaphore, #tpu.memory_space<semaphore_mem>>
    %251 = tpu.memref_squeeze %250 : memref<1x!tpu.dma_semaphore, #tpu.memory_space<semaphore_mem>> -> memref<!tpu.dma_semaphore, #tpu.memory_space<semaphore_mem>>
    tpu.wait_dma2 semaphore(%251 : memref<!tpu.dma_semaphore, #tpu.memory_space<semaphore_mem>>) src(%247 : memref<128xf32, #tpu.memory_space<any>>) dst(%249 : memref<128xf32, #tpu.memory_space<vmem>>)
    %c4_i32_89 = arith.constant 4 : i32
    %252 = arith.addi %219, %c4_i32_89 : i32
    %253 = arith.addi %219, %c4_i32_89 : i32
    %c0_i32_90 = arith.constant 0 : i32
    %c0_i32_91 = arith.constant 0 : i32
    %254 = tpu.memref_slice %arg2[%c0_i32_90, %c0_i32_91] : memref<256x128xf32, #tpu.memory_space<any>> -> memref<1x128xf32, #tpu.memory_space<any>>
    %255 = tpu.memref_squeeze %254 : memref<1x128xf32, #tpu.memory_space<any>> -> memref<128xf32, #tpu.memory_space<any>>
    %c0_i32_92 = arith.constant 0 : i32
    %256 = tpu.memref_slice %arg5[%252, %c0_i32_92] : memref<16x128xf32, #tpu.memory_space<vmem>> -> memref<1x128xf32, #tpu.memory_space<vmem>>
    %257 = tpu.memref_squeeze %256 : memref<1x128xf32, #tpu.memory_space<vmem>> -> memref<128xf32, #tpu.memory_space<vmem>>
    %258 = tpu.memref_slice %arg6[%253] : memref<16x!tpu.dma_semaphore, #tpu.memory_space<semaphore_mem>> -> memref<1x!tpu.dma_semaphore, #tpu.memory_space<semaphore_mem>>
    %259 = tpu.memref_squeeze %258 : memref<1x!tpu.dma_semaphore, #tpu.memory_space<semaphore_mem>> -> memref<!tpu.dma_semaphore, #tpu.memory_space<semaphore_mem>>
    tpu.wait_dma2 semaphore(%259 : memref<!tpu.dma_semaphore, #tpu.memory_space<semaphore_mem>>) src(%255 : memref<128xf32, #tpu.memory_space<any>>) dst(%257 : memref<128xf32, #tpu.memory_space<vmem>>)
    %c5_i32_93 = arith.constant 5 : i32
    %260 = arith.addi %219, %c5_i32_93 : i32
    %261 = arith.addi %219, %c5_i32_93 : i32
    %c0_i32_94 = arith.constant 0 : i32
    %c0_i32_95 = arith.constant 0 : i32
    %262 = tpu.memref_slice %arg2[%c0_i32_94, %c0_i32_95] : memref<256x128xf32, #tpu.memory_space<any>> -> memref<1x128xf32, #tpu.memory_space<any>>
    %263 = tpu.memref_squeeze %262 : memref<1x128xf32, #tpu.memory_space<any>> -> memref<128xf32, #tpu.memory_space<any>>
    %c0_i32_96 = arith.constant 0 : i32
    %264 = tpu.memref_slice %arg5[%260, %c0_i32_96] : memref<16x128xf32, #tpu.memory_space<vmem>> -> memref<1x128xf32, #tpu.memory_space<vmem>>
    %265 = tpu.memref_squeeze %264 : memref<1x128xf32, #tpu.memory_space<vmem>> -> memref<128xf32, #tpu.memory_space<vmem>>
    %266 = tpu.memref_slice %arg6[%261] : memref<16x!tpu.dma_semaphore, #tpu.memory_space<semaphore_mem>> -> memref<1x!tpu.dma_semaphore, #tpu.memory_space<semaphore_mem>>
    %267 = tpu.memref_squeeze %266 : memref<1x!tpu.dma_semaphore, #tpu.memory_space<semaphore_mem>> -> memref<!tpu.dma_semaphore, #tpu.memory_space<semaphore_mem>>
    tpu.wait_dma2 semaphore(%267 : memref<!tpu.dma_semaphore, #tpu.memory_space<semaphore_mem>>) src(%263 : memref<128xf32, #tpu.memory_space<any>>) dst(%265 : memref<128xf32, #tpu.memory_space<vmem>>)
    %c6_i32_97 = arith.constant 6 : i32
    %268 = arith.addi %219, %c6_i32_97 : i32
    %269 = arith.addi %219, %c6_i32_97 : i32
    %c0_i32_98 = arith.constant 0 : i32
    %c0_i32_99 = arith.constant 0 : i32
    %270 = tpu.memref_slice %arg2[%c0_i32_98, %c0_i32_99] : memref<256x128xf32, #tpu.memory_space<any>> -> memref<1x128xf32, #tpu.memory_space<any>>
    %271 = tpu.memref_squeeze %270 : memref<1x128xf32, #tpu.memory_space<any>> -> memref<128xf32, #tpu.memory_space<any>>
    %c0_i32_100 = arith.constant 0 : i32
    %272 = tpu.memref_slice %arg5[%268, %c0_i32_100] : memref<16x128xf32, #tpu.memory_space<vmem>> -> memref<1x128xf32, #tpu.memory_space<vmem>>
    %273 = tpu.memref_squeeze %272 : memref<1x128xf32, #tpu.memory_space<vmem>> -> memref<128xf32, #tpu.memory_space<vmem>>
    %274 = tpu.memref_slice %arg6[%269] : memref<16x!tpu.dma_semaphore, #tpu.memory_space<semaphore_mem>> -> memref<1x!tpu.dma_semaphore, #tpu.memory_space<semaphore_mem>>
    %275 = tpu.memref_squeeze %274 : memref<1x!tpu.dma_semaphore, #tpu.memory_space<semaphore_mem>> -> memref<!tpu.dma_semaphore, #tpu.memory_space<semaphore_mem>>
    tpu.wait_dma2 semaphore(%275 : memref<!tpu.dma_semaphore, #tpu.memory_space<semaphore_mem>>) src(%271 : memref<128xf32, #tpu.memory_space<any>>) dst(%273 : memref<128xf32, #tpu.memory_space<vmem>>)
    %c7_i32_101 = arith.constant 7 : i32
    %276 = arith.addi %219, %c7_i32_101 : i32
    %277 = arith.addi %219, %c7_i32_101 : i32
    %c0_i32_102 = arith.constant 0 : i32
    %c0_i32_103 = arith.constant 0 : i32
    %278 = tpu.memref_slice %arg2[%c0_i32_102, %c0_i32_103] : memref<256x128xf32, #tpu.memory_space<any>> -> memref<1x128xf32, #tpu.memory_space<any>>
    %279 = tpu.memref_squeeze %278 : memref<1x128xf32, #tpu.memory_space<any>> -> memref<128xf32, #tpu.memory_space<any>>
    %c0_i32_104 = arith.constant 0 : i32
    %280 = tpu.memref_slice %arg5[%276, %c0_i32_104] : memref<16x128xf32, #tpu.memory_space<vmem>> -> memref<1x128xf32, #tpu.memory_space<vmem>>
    %281 = tpu.memref_squeeze %280 : memref<1x128xf32, #tpu.memory_space<vmem>> -> memref<128xf32, #tpu.memory_space<vmem>>
    %282 = tpu.memref_slice %arg6[%277] : memref<16x!tpu.dma_semaphore, #tpu.memory_space<semaphore_mem>> -> memref<1x!tpu.dma_semaphore, #tpu.memory_space<semaphore_mem>>
    %283 = tpu.memref_squeeze %282 : memref<1x!tpu.dma_semaphore, #tpu.memory_space<semaphore_mem>> -> memref<!tpu.dma_semaphore, #tpu.memory_space<semaphore_mem>>
    tpu.wait_dma2 semaphore(%283 : memref<!tpu.dma_semaphore, #tpu.memory_space<semaphore_mem>>) src(%279 : memref<128xf32, #tpu.memory_space<any>>) dst(%281 : memref<128xf32, #tpu.memory_space<vmem>>)
    %c8_i32_105 = arith.constant 8 : i32
    %284 = arith.index_cast %219 : i32 to index
    %c0_106 = arith.constant 0 : index
    %285 = vector.load %arg5[%284, %c0_106] : memref<16x128xf32, #tpu.memory_space<vmem>>, vector<8x128xf32>
    %286 = vector.broadcast %145 : vector<1x128xf32> to vector<8x128xf32>
    %287 = arith.addf %285, %286 : vector<8x128xf32>
    %288 = arith.index_cast %219 : i32 to index
    %c0_107 = arith.constant 0 : index
    %289 = vector.load %arg4[%288, %c0_107] : memref<16x128xf32, #tpu.memory_space<vmem>>, vector<8x128xf32>
    tpu.vector_store %arg4[%288, %c0_107], %287 {strides = array<i32>} : memref<16x128xf32, #tpu.memory_space<vmem>>, vector<8x128xf32>,
    %c2_i32_108 = arith.constant 2 : i32
    return
  }
  func.func @transform_1(%arg0: i32, %arg1: memref<16xi32, #tpu.memory_space<smem>>) -> (i32, i32) {
    %c0_i32 = arith.constant 0 : i32
    %c0_i32_0 = arith.constant 0 : i32
    %c0_i32_1 = arith.constant 0 : i32
    return %c0_i32, %c0_i32_0 : i32, i32
  }
  func.func @transform_2(%arg0: i32, %arg1: memref<16xi32, #tpu.memory_space<smem>>) -> (i32, i32) {
    %c0_i32 = arith.constant 0 : i32
    %c0_i32_0 = arith.constant 0 : i32
    return %arg0, %c0_i32 : i32, i32
  }
}

</mosaic_0001>

<bundles_post_ra>
// kernel: tpu_custom_call.1
= control target key start
LH: loop header
LB: loop body
LE: loop exit
PB: predicated region body
PF: predicated region fallthrough
CT: control target
= control target key end

     0   :  { %s1044_s15 = smov [#allocation5]   ;;  %s1267_s0 = inlined_call_operand.hbm [shape: s32[16], index: 0, kind: input, shape index: {}]   ;;  %s1268_s1 = inlined_call_operand.hbm [shape: f32[256,128], index: 1, kind: input, shape index: {}]   ;;  %s1269_s2 = inlined_call_operand.vmem [shape: f32[1,128], index: 2, kind: input, shape index: {}]   ;;  %s1270_s3 = inlined_call_operand.hbm [shape: f32[16,128], index: 3, kind: output, shape index: {}]  }
   0x1   :  { %s9_s14 = sshll.u32 %s1267_s0, 4  ;;  %s10_s14 = int_to_ptr.hbm [resolvable:$true] %s9_s14 }
   0x2   :  { %12 = dma.hbm_to_smem %s10_s14, 16, %s1044_s15, [#allocation4] }
   0x3   :  { %1008 = dma.done.wait [#allocation4], 16 }
   0x4   :  { %1009 = vsyncadd [#allocation4], 4294967280 }
   0x5   :  { %15 = sfence }
   0x6   :  { %16 = vsyncpa [#allocation7], 0  ;;  %s20_s16 = sld [smem:[#allocation5]]  ;;  %s1045_s17 = smov [#allocation2]  }
   0x7   :  { %s31_s18 = sshll.u32 %s1045_s17, 4  ;;  %s537_s19 = sld [smem:[#allocation5 + $0x1]]  ;;  %s32_s18 = int_to_ptr.vmem [resolvable:$true] %s31_s18 }
   0x8   :  { %s1046_s20 = smov [#allocation2 + $0x1]   ;;  %s1089_s22 = sld [smem:[#allocation5 + $0x2]] }
   0x9   :  { %s1087_s21 = sshll.u32 %s1046_s20, 4  ;;  %s1047_s0 = smov [#allocation2 + $0x2]   ;;  %s50_s21 = int_to_ptr.vmem [resolvable:$true] %s1087_s21 }
   0xa   :  { %s1092_s23 = sshll.u32 %s1047_s0, 4  ;;  %s1094_s24 = sld [smem:[#allocation5 + $0x3]]  ;;  %s68_s23 = int_to_ptr.vmem [resolvable:$true] %s1092_s23 }
   0xb   :  { %s1106_s10 = scalar_lea.hbm %s1268_s1, 256 }
   0xc   :  { %s21_s27 = scalar_lea.hbm %s1268_s1, %s20_s16 }
   0xd   :  { %s29_s28 = sshll.u32 %s21_s27, 4  ;;  %s37_s4 = scalar_lea.hbm %s1268_s1, %s537_s19  ;;  %s30_s28 = int_to_ptr.hbm [resolvable:$true] %s29_s28 }
   0xe   :  { %s47_s5 = sshll.u32 %s37_s4, 4  ;;  %s600_s6 = sshra.s32 %s30_s28, 4  ;;  %s601_s6 = int_to_ptr.hbm [resolvable:$true] %s600_s6  ;;  %s48_s5 = int_to_ptr.hbm [resolvable:$true] %s47_s5 }
   0xf   :  { %s602_s7 = scalar_lea.hbm %s601_s6, 1  ;;  %p605_p1 = scmp.lt.s32.totalorder %s601_s6, %s1268_s1 }
  0x10   :  { %p603_p0 = scmp.ne.s32.totalorder %s601_s6, %s602_s7  ;;  %p606_p2 = scmp.lt.s32.totalorder %s1106_s10, %s602_s7 }
  0x12   :  { %p607_p3 = por %p606_p2, %p605_p1 }
  0x14   :  { %p608_p4 = pnand %p607_p3, %p603_p0 }
  0x16   :  { %611 = shalt.err (!%p608_p4)  }
  0x17   :  { %34 = dma.hbm_to_vmem [thread:$0]  %s30_s28, 16, %s32_s18, [#allocation3] }
  0x18   :  { %s55_s15 = scalar_lea.hbm %s1268_s1, %s1089_s22  ;;  %s624_s16 = sshra.s32 %s48_s5, 4  ;;  %s625_s16 = int_to_ptr.hbm [resolvable:$true] %s624_s16 }
  0x19   :  { %s626_s17 = scalar_lea.hbm %s625_s16, 1  ;;  %p629_p6 = scmp.lt.s32.totalorder %s625_s16, %s1268_s1 }
  0x1a   :  { %p627_p5 = scmp.ne.s32.totalorder %s625_s16, %s626_s17  ;;  %p630_p7 = scmp.lt.s32.totalorder %s1106_s10, %s626_s17 }
  0x1c   :  { %p631_p8 = por %p630_p7, %p629_p6 }
  0x1e   :  { %p632_p9 = pnand %p631_p8, %p627_p5 }
  0x20   :  { %635 = shalt.err (!%p632_p9)  }
  0x21   :  { %52 = dma.hbm_to_vmem [thread:$0]  %s48_s5, 16, %s50_s21, [#allocation3 + $0x1] }
  0x22   :  { %s65_s18 = sshll.u32 %s55_s15, 4  ;;  %s73_s25 = scalar_lea.hbm %s1268_s1, %s1094_s24  ;;  %s66_s18 = int_to_ptr.hbm [resolvable:$true] %s65_s18 }
  0x23   :  { %s83_s26 = sshll.u32 %s73_s25, 4  ;;  %s648_s27 = sshra.s32 %s66_s18, 4  ;;  %s649_s27 = int_to_ptr.hbm [resolvable:$true] %s648_s27  ;;  %s84_s26 = int_to_ptr.hbm [resolvable:$true] %s83_s26 }
  0x24   :  { %s650_s28 = scalar_lea.hbm %s649_s27, 1  ;;  %p653_p11 = scmp.lt.s32.totalorder %s649_s27, %s1268_s1 }
  0x25   :  { %p651_p10 = scmp.ne.s32.totalorder %s649_s27, %s650_s28  ;;  %p654_p12 = scmp.lt.s32.totalorder %s1106_s10, %s650_s28 }
  0x27   :  { %p655_p13 = por %p654_p12, %p653_p11 }
  0x29   :  { %p656_p0 = pnand %p655_p13, %p651_p10 }
  0x2b   :  { %659 = shalt.err (!%p656_p0)  }
  0x2c   :  { %70 = dma.hbm_to_vmem [thread:$0]  %s66_s18, 16, %s68_s23, [#allocation3 + $0x2] }
  0x2d   :  { %s1048_s21 = smov [#allocation2 + $0x3]   ;;  %s540_s4 = sld [smem:[#allocation5 + $0x4]] }
  0x2e   :  { %s85_s24 = sshll.u32 %s1048_s21, 4  ;;  %s672_s5 = sshra.s32 %s84_s26, 4  ;;  %s86_s24 = int_to_ptr.vmem [resolvable:$true] %s85_s24  ;;  %s673_s5 = int_to_ptr.hbm [resolvable:$true] %s672_s5 }
  0x2f   :  { %s674_s6 = scalar_lea.hbm %s673_s5, 1  ;;  %p677_p2 = scmp.lt.s32.totalorder %s673_s5, %s1268_s1 }
  0x30   :  { %p675_p1 = scmp.ne.s32.totalorder %s673_s5, %s674_s6  ;;  %p678_p3 = scmp.lt.s32.totalorder %s1106_s10, %s674_s6 }
  0x32   :  { %p679_p4 = por %p678_p3, %p677_p2 }
  0x34   :  { %p680_p5 = pnand %p679_p4, %p675_p1 }
  0x36   :  { %683 = shalt.err (!%p680_p5)  }
  0x37   :  { %88 = dma.hbm_to_vmem [thread:$0]  %s84_s26, 16, %s86_s24, [#allocation3 + $0x3] }
  0x38   :  { %s1049_s9 = smov [#allocation2 + $0x4]   ;;  %s541_s11 = sld [smem:[#allocation5 + $0x5]] }
  0x39   :  { %s103_s23 = sshll.u32 %s1049_s9, 4  ;;  %s1050_s12 = smov [#allocation2 + $0x5]   ;;  %s104_s23 = int_to_ptr.vmem [resolvable:$true] %s103_s23 }
  0x3a   :  { %s1136_s13 = sshll.u32 %s1050_s12, 4  ;;  %s542_s14 = sld [smem:[#allocation5 + $0x6]]  ;;  %s122_s13 = int_to_ptr.vmem [resolvable:$true] %s1136_s13 }
  0x3b   :  { %s91_s17 = scalar_lea.hbm %s1268_s1, %s540_s4  ;;  %s1051_s20 = smov [#allocation2 + $0x6]  }
  0x3c   :  { %s101_s19 = sshll.u32 %s91_s17, 4  ;;  %s1142_s18 = sshll.u32 %s1051_s20, 4  ;;  %s102_s19 = int_to_ptr.hbm [resolvable:$true] %s101_s19  ;;  %s140_s18 = int_to_ptr.vmem [resolvable:$true] %s1142_s18 }
  0x3d   :  { %s696_s0 = sshra.s32 %s102_s19, 4  ;;  %s697_s0 = int_to_ptr.hbm [resolvable:$true] %s696_s0 }
  0x3e   :  { %s698_s22 = scalar_lea.hbm %s697_s0, 1  ;;  %p701_p7 = scmp.lt.s32.totalorder %s697_s0, %s1268_s1 }
  0x3f   :  { %p699_p6 = scmp.ne.s32.totalorder %s697_s0, %s698_s22  ;;  %p702_p8 = scmp.lt.s32.totalorder %s1106_s10, %s698_s22 }
  0x41   :  { %p703_p9 = por %p702_p8, %p701_p7 }
  0x43   :  { %p704_p10 = pnand %p703_p9, %p699_p6 }
  0x45   :  { %707 = shalt.err (!%p704_p10)  }
  0x46   :  { %106 = dma.hbm_to_vmem [thread:$0]  %s102_s19, 16, %s104_s23, [#allocation3 + $0x4] }
  0x47   :  { %s109_s29 = scalar_lea.hbm %s1268_s1, %s541_s11  ;;  %s127_s4 = scalar_lea.hbm %s1268_s1, %s542_s14 }
  0x48   :  { %s119_s30 = sshll.u32 %s109_s29, 4  ;;  %s137_s5 = sshll.u32 %s127_s4, 4  ;;  %s120_s30 = int_to_ptr.hbm [resolvable:$true] %s119_s30  ;;  %s138_s5 = int_to_ptr.hbm [resolvable:$true] %s137_s5 }
  0x49   :  { %s720_s6 = sshra.s32 %s120_s30, 4  ;;  %s721_s6 = int_to_ptr.hbm [resolvable:$true] %s720_s6 }
  0x4a   :  { %s722_s7 = scalar_lea.hbm %s721_s6, 1  ;;  %p725_p12 = scmp.lt.s32.totalorder %s721_s6, %s1268_s1 }
  0x4b   :  { %p723_p11 = scmp.ne.s32.totalorder %s721_s6, %s722_s7  ;;  %p726_p13 = scmp.lt.s32.totalorder %s1106_s10, %s722_s7 }
  0x4d   :  { %p727_p0 = por %p726_p13, %p725_p12 }
  0x4f   :  { %p728_p1 = pnand %p727_p0, %p723_p11 }
  0x51   :  { %731 = shalt.err (!%p728_p1)  }
  0x52   :  { %124 = dma.hbm_to_vmem [thread:$0]  %s120_s30, 16, %s122_s13, [#allocation3 + $0x5] }
  0x53   :  { %s543_s23 = sld [smem:[#allocation5 + $0x7]]  ;;  %s744_s11 = sshra.s32 %s138_s5, 4  ;;  %s745_s11 = int_to_ptr.hbm [resolvable:$true] %s744_s11 }
  0x54   :  { %s746_s12 = scalar_lea.hbm %s745_s11, 1  ;;  %p749_p3 = scmp.lt.s32.totalorder %s745_s11, %s1268_s1 }
  0x55   :  { %p747_p2 = scmp.ne.s32.totalorder %s745_s11, %s746_s12  ;;  %p750_p4 = scmp.lt.s32.totalorder %s1106_s10, %s746_s12 }
  0x57   :  { %p751_p5 = por %p750_p4, %p749_p3 }
  0x59   :  { %p752_p6 = pnand %p751_p5, %p747_p2 }
  0x5b   :  { %755 = shalt.err (!%p752_p6)  }
  0x5c   :  { %142 = dma.hbm_to_vmem [thread:$0]  %s138_s5, 16, %s140_s18, [#allocation3 + $0x6] }
  0x5d   :  { %s544_s16 = sld [smem:[#allocation5 + $0x8]]  ;;  %s1052_s17 = smov [#allocation2 + $0x7]  }
  0x5e   :  { %s157_s19 = sshll.u32 %s1052_s17, 4  ;;  %s1053_s13 = smov [#allocation2 + $0x8]   ;;  %s158_s19 = int_to_ptr.vmem [resolvable:$true] %s157_s19 }
  0x5f   :  { %s1165_s20 = sshll.u32 %s1053_s13, 4  ;;  %s1168_s0 = sld [smem:[#allocation5 + $0x9]]  ;;  %s176_s20 = int_to_ptr.vmem [resolvable:$true] %s1165_s20 }
  0x60   :  { %s145_s26 = scalar_lea.hbm %s1268_s1, %s543_s23  ;;  %s1054_s28 = smov [#allocation2 + $0x9]  }
  0x61   :  { %s155_s27 = sshll.u32 %s145_s26, 4  ;;  %s1173_s29 = sshll.u32 %s1054_s28, 4  ;;  %s156_s27 = int_to_ptr.hbm [resolvable:$true] %s155_s27  ;;  %s194_s29 = int_to_ptr.vmem [resolvable:$true] %s1173_s29 }
  0x62   :  { %s768_s24 = sshra.s32 %s156_s27, 4  ;;  %s769_s24 = int_to_ptr.hbm [resolvable:$true] %s768_s24 }
  0x63   :  { %s163_s21 = scalar_lea.hbm %s1268_s1, %s544_s16  ;;  %s770_s4 = scalar_lea.hbm %s769_s24, 1 }
  0x64   :  { %p771_p7 = scmp.ne.s32.totalorder %s769_s24, %s770_s4  ;;  %p773_p8 = scmp.lt.s32.totalorder %s769_s24, %s1268_s1 }
  0x65   :  { %p774_p9 = scmp.lt.s32.totalorder %s1106_s10, %s770_s4 }
  0x67   :  { %p775_p10 = por %p774_p9, %p773_p8 }
  0x69   :  { %p776_p11 = pnand %p775_p10, %p771_p7 }
  0x6b   :  { %779 = shalt.err (!%p776_p11)  }
  0x6c   :  { %160 = dma.hbm_to_vmem [thread:$0]  %s156_s27, 16, %s158_s19, [#allocation3 + $0x7]  ;;  %v1186_v0 = vld [vmem:[%s1269_s2] sm:$0x1] }
  0x6d   :  { %s173_s7 = sshll.u32 %s163_s21, 4  ;;  %s181_s12 = scalar_lea.hbm %s1268_s1, %s1168_s0  ;;  %s174_s7 = int_to_ptr.hbm [resolvable:$true] %s173_s7 }
  0x6e   :  { %s792_s14 = sshra.s32 %s174_s7, 4  ;;  %s793_s14 = int_to_ptr.hbm [resolvable:$true] %s792_s14 }
  0x6f   :  { %s794_s15 = scalar_lea.hbm %s793_s14, 1  ;;  %p797_p13 = scmp.lt.s32.totalorder %s793_s14, %s1268_s1 }
  0x70   :  { %p795_p12 = scmp.ne.s32.totalorder %s793_s14, %s794_s15  ;;  %p798_p0 = scmp.lt.s32.totalorder %s1106_s10, %s794_s15 }
  0x72   :  { %p799_p1 = por %p798_p0, %p797_p13 }
  0x74   :  { %p800_p2 = pnand %p799_p1, %p795_p12 }
  0x76   :  { %803 = shalt.err (!%p800_p2)  }
  0x77   :  { %178 = dma.hbm_to_vmem [thread:$0]  %s174_s7, 16, %s176_s20, [#allocation3 + $0x8] }
  0x78   :  { %s191_s2 = sshll.u32 %s181_s12, 4  ;;  %s546_s19 = sld [smem:[#allocation5 + $0xa]]  ;;  %s192_s2 = int_to_ptr.hbm [resolvable:$true] %s191_s2 }
  0x79   :  { %s816_s13 = sshra.s32 %s192_s2, 4  ;;  %s817_s13 = int_to_ptr.hbm [resolvable:$true] %s816_s13 }
  0x7a   :  { %s818_s0 = scalar_lea.hbm %s817_s13, 1  ;;  %p821_p4 = scmp.lt.s32.totalorder %s817_s13, %s1268_s1 }
  0x7b   :  { %p819_p3 = scmp.ne.s32.totalorder %s817_s13, %s818_s0  ;;  %p822_p5 = scmp.lt.s32.totalorder %s1106_s10, %s818_s0 }
  0x7d   :  { %p823_p6 = por %p822_p5, %p821_p4 }
  0x7f   :  { %p824_p7 = pnand %p823_p6, %p819_p3 }
  0x81   :  { %827 = shalt.err (!%p824_p7)  }
  0x82   :  { %196 = dma.hbm_to_vmem [thread:$0]  %s192_s2, 16, %s194_s29, [#allocation3 + $0x9] }
  0x83   :  { %s1055_s26 = smov [#allocation2 + $0xa]   ;;  %s547_s28 = sld [smem:[#allocation5 + $0xb]] }
  0x84   :  { %s211_s27 = sshll.u32 %s1055_s26, 4  ;;  %s1056_s20 = smov [#allocation2 + $0xb]   ;;  %s212_s27 = int_to_ptr.vmem [resolvable:$true] %s211_s27 }
  0x85   :  { %s1202_s18 = sshll.u32 %s1056_s20, 4  ;;  %s548_s30 = sld [smem:[#allocation5 + $0xc]]  ;;  %s230_s18 = int_to_ptr.vmem [resolvable:$true] %s1202_s18 }
  0x86   :  { %s199_s4 = scalar_lea.hbm %s1268_s1, %s546_s19  ;;  %s1057_s6 = smov [#allocation2 + $0xc]  }
  0x87   :  { %s209_s5 = sshll.u32 %s199_s4, 4  ;;  %s1208_s7 = sshll.u32 %s1057_s6, 4  ;;  %s210_s5 = int_to_ptr.hbm [resolvable:$true] %s209_s5  ;;  %s248_s7 = int_to_ptr.vmem [resolvable:$true] %s1208_s7 }
  0x88   :  { %s840_s29 = sshra.s32 %s210_s5, 4  ;;  %s841_s29 = int_to_ptr.hbm [resolvable:$true] %s840_s29 }
  0x89   :  { %s842_s8 = scalar_lea.hbm %s841_s29, 1  ;;  %p845_p9 = scmp.lt.s32.totalorder %s841_s29, %s1268_s1 }
  0x8a   :  { %p843_p8 = scmp.ne.s32.totalorder %s841_s29, %s842_s8  ;;  %p846_p10 = scmp.lt.s32.totalorder %s1106_s10, %s842_s8 }
  0x8c   :  { %p847_p11 = por %p846_p10, %p845_p9 }
  0x8e   :  { %p848_p12 = pnand %p847_p11, %p843_p8 }
  0x90   :  { %851 = shalt.err (!%p848_p12)  }
  0x91   :  { %214 = dma.hbm_to_vmem [thread:$0]  %s210_s5, 16, %s212_s27, [#allocation3 + $0xa] }
  0x92   :  { %s217_s14 = scalar_lea.hbm %s1268_s1, %s547_s28  ;;  %s235_s2 = scalar_lea.hbm %s1268_s1, %s548_s30 }
  0x93   :  { %s227_s15 = sshll.u32 %s217_s14, 4  ;;  %s245_s19 = sshll.u32 %s235_s2, 4  ;;  %s228_s15 = int_to_ptr.hbm [resolvable:$true] %s227_s15  ;;  %s246_s19 = int_to_ptr.hbm [resolvable:$true] %s245_s19 }
  0x94   :  { %s864_s13 = sshra.s32 %s228_s15, 4  ;;  %s865_s13 = int_to_ptr.hbm [resolvable:$true] %s864_s13 }
  0x95   :  { %s866_s0 = scalar_lea.hbm %s865_s13, 1  ;;  %p869_p0 = scmp.lt.s32.totalorder %s865_s13, %s1268_s1 }
  0x96   :  { %p867_p13 = scmp.ne.s32.totalorder %s865_s13, %s866_s0  ;;  %p870_p1 = scmp.lt.s32.totalorder %s1106_s10, %s866_s0 }
  0x98   :  { %p871_p2 = por %p870_p1, %p869_p0 }
  0x9a   :  { %p872_p3 = pnand %p871_p2, %p867_p13 }
  0x9c   :  { %875 = shalt.err (!%p872_p3)  }
  0x9d   :  { %232 = dma.hbm_to_vmem [thread:$0]  %s228_s15, 16, %s230_s18, [#allocation3 + $0xb] }
  0x9e   :  { %s549_s26 = sld [smem:[#allocation5 + $0xd]]  ;;  %s888_s27 = sshra.s32 %s246_s19, 4  ;;  %s889_s27 = int_to_ptr.hbm [resolvable:$true] %s888_s27 }
  0x9f   :  { %s890_s28 = scalar_lea.hbm %s889_s27, 1  ;;  %p893_p5 = scmp.lt.s32.totalorder %s889_s27, %s1268_s1 }
  0xa0   :  { %p891_p4 = scmp.ne.s32.totalorder %s889_s27, %s890_s28  ;;  %p894_p6 = scmp.lt.s32.totalorder %s1106_s10, %s890_s28 }
  0xa2   :  { %p895_p7 = por %p894_p6, %p893_p5 }
  0xa4   :  { %p896_p8 = pnand %p895_p7, %p891_p4 }
  0xa6   :  { %899 = shalt.err (!%p896_p8)  }
  0xa7   :  { %250 = dma.hbm_to_vmem [thread:$0]  %s246_s19, 16, %s248_s7, [#allocation3 + $0xc] }
  0xa8   :  { %s550_s21 = sld [smem:[#allocation5 + $0xe]]  ;;  %s1058_s24 = smov [#allocation2 + $0xd]  }
  0xa9   :  { %s265_s4 = sshll.u32 %s1058_s24, 4  ;;  %s1059_s18 = smov [#allocation2 + $0xe]   ;;  %s266_s4 = int_to_ptr.vmem [resolvable:$true] %s265_s4 }
  0xaa   :  { %s1231_s5 = sshll.u32 %s1059_s18, 4  ;;  %s1234_s6 = sld [smem:[#allocation5 + $0xf]]  ;;  %s284_s5 = int_to_ptr.vmem [resolvable:$true] %s1231_s5 }
  0xab   :  { %s253_s9 = scalar_lea.hbm %s1268_s1, %s549_s26  ;;  %s1060_s11 = smov [#allocation2 + $0xf]  }
  0xac   :  { %s263_s23 = sshll.u32 %s253_s9, 4  ;;  %s1239_s12 = sshll.u32 %s1060_s11, 4  ;;  %s264_s23 = int_to_ptr.hbm [resolvable:$true] %s263_s23  ;;  %s302_s12 = int_to_ptr.vmem [resolvable:$true] %s1239_s12 }
  0xad   :  { %s912_s16 = sshra.s32 %s264_s23, 4  ;;  %s913_s16 = int_to_ptr.hbm [resolvable:$true] %s912_s16 }
  0xae   :  { %s271_s15 = scalar_lea.hbm %s1268_s1, %s550_s21  ;;  %s914_s17 = scalar_lea.hbm %s913_s16, 1 }
  0xaf   :  { %p915_p9 = scmp.ne.s32.totalorder %s913_s16, %s914_s17  ;;  %p917_p10 = scmp.lt.s32.totalorder %s913_s16, %s1268_s1 }
  0xb0   :  { %p918_p11 = scmp.lt.s32.totalorder %s1106_s10, %s914_s17 }
  0xb2   :  { %p919_p12 = por %p918_p11, %p917_p10 }
  0xb4   :  { %p920_p13 = pnand %p919_p12, %p915_p9 }
  0xb6   :  { %923 = shalt.err (!%p920_p13)  }
  0xb7   :  { %268 = dma.hbm_to_vmem [thread:$0]  %s264_s23, 16, %s266_s4, [#allocation3 + $0xd] }
  0xb8   :  { %s281_s13 = sshll.u32 %s271_s15, 4  ;;  %s289_s25 = scalar_lea.hbm %s1268_s1, %s1234_s6  ;;  %s282_s13 = int_to_ptr.hbm [resolvable:$true] %s281_s13 }
  0xb9   :  { %s936_s26 = sshra.s32 %s282_s13, 4  ;;  %s937_s26 = int_to_ptr.hbm [resolvable:$true] %s936_s26 }
  0xba   :  { %s938_s27 = scalar_lea.hbm %s937_s26, 1  ;;  %p941_p1 = scmp.lt.s32.totalorder %s937_s26, %s1268_s1 }
  0xbb   :  { %p939_p0 = scmp.ne.s32.totalorder %s937_s26, %s938_s27  ;;  %p942_p2 = scmp.lt.s32.totalorder %s1106_s10, %s938_s27 }
  0xbd   :  { %p943_p3 = por %p942_p2, %p941_p1 }
  0xbf   :  { %p944_p4 = pnand %p943_p3, %p939_p0 }
  0xc1   :  { %947 = shalt.err (!%p944_p4)  }
  0xc2   :  { %286 = dma.hbm_to_vmem [thread:$0]  %s282_s13, 16, %s284_s5, [#allocation3 + $0xe] }
  0xc3   :  { %s299_s30 = sshll.u32 %s289_s25, 4  ;;  %s300_s30 = int_to_ptr.hbm [resolvable:$true] %s299_s30 }
  0xc4   :  { %s960_s21 = sshra.s32 %s300_s30, 4  ;;  %s961_s21 = int_to_ptr.hbm [resolvable:$true] %s960_s21 }
  0xc5   :  { %s962_s24 = scalar_lea.hbm %s961_s21, 1  ;;  %p965_p6 = scmp.lt.s32.totalorder %s961_s21, %s1268_s1 }
  0xc6   :  { %p963_p5 = scmp.ne.s32.totalorder %s961_s21, %s962_s24  ;;  %p966_p7 = scmp.lt.s32.totalorder %s1106_s10, %s962_s24 }
  0xc8   :  { %p967_p8 = por %p966_p7, %p965_p6 }
  0xca   :  { %p968_p9 = pnand %p967_p8, %p963_p5 }
  0xcc   :  { %971 = shalt.err (!%p968_p9)  }
  0xcd   :  { %304 = dma.hbm_to_vmem [thread:$0]  %s300_s30, 16, %s302_s12, [#allocation3 + $0xf] }
  0xce   :  { %1010 = dma.done.wait [#allocation3], 16 }
  0xcf   :  { %1011 = vsyncadd [#allocation3], 4294967280 }
  0xd0   :  { %1012 = dma.done.wait [#allocation3 + $0x1], 16 }
  0xd1   :  { %1013 = vsyncadd [#allocation3 + $0x1], 4294967280 }
  0xd2   :  { %1014 = dma.done.wait [#allocation3 + $0x2], 16 }
  0xd3   :  { %1015 = vsyncadd [#allocation3 + $0x2], 4294967280 }
  0xd4   :  { %1016 = dma.done.wait [#allocation3 + $0x3], 16 }
  0xd5   :  { %1017 = vsyncadd [#allocation3 + $0x3], 4294967280 }
  0xd6   :  { %1018 = dma.done.wait [#allocation3 + $0x4], 16 }
  0xd7   :  { %1019 = vsyncadd [#allocation3 + $0x4], 4294967280 }
  0xd8   :  { %1020 = dma.done.wait [#allocation3 + $0x5], 16 }
  0xd9   :  { %1021 = vsyncadd [#allocation3 + $0x5], 4294967280 }
  0xda   :  { %1022 = dma.done.wait [#allocation3 + $0x6], 16 }
  0xdb   :  { %1023 = vsyncadd [#allocation3 + $0x6], 4294967280 }
  0xdc   :  { %1024 = dma.done.wait [#allocation3 + $0x7], 16 }
  0xdd   :  { %1025 = vsyncadd [#allocation3 + $0x7], 4294967280  ;;  %v338_v1 = vperm.slane %v1186_v0, 0  ;;  %v336_v2 = vld [vmem:[#allocation2] sm:$0xff] }
  0xdf   :  { %v340_v3 = vadd.f32 %v338_v1, %v336_v2 }
  0xe1   :  { %341 = vst [vmem:[#allocation6] sm:$0xff] %v340_v3 }
  0xe2   :  { %1026 = dma.done.wait [#allocation3 + $0x8], 16 }
  0xe3   :  { %1027 = vsyncadd [#allocation3 + $0x8], 4294967280 }
  0xe4   :  { %1028 = dma.done.wait [#allocation3 + $0x9], 16 }
  0xe5   :  { %1029 = vsyncadd [#allocation3 + $0x9], 4294967280 }
  0xe6   :  { %1030 = dma.done.wait [#allocation3 + $0xa], 16 }
  0xe7   :  { %1031 = vsyncadd [#allocation3 + $0xa], 4294967280 }
  0xe8   :  { %1032 = dma.done.wait [#allocation3 + $0xb], 16 }
  0xe9   :  { %1033 = vsyncadd [#allocation3 + $0xb], 4294967280 }
  0xea   :  { %1034 = dma.done.wait [#allocation3 + $0xc], 16 }
  0xeb   :  { %1035 = vsyncadd [#allocation3 + $0xc], 4294967280 }
  0xec   :  { %1036 = dma.done.wait [#allocation3 + $0xd], 16 }
  0xed   :  { %1037 = vsyncadd [#allocation3 + $0xd], 4294967280 }
  0xee   :  { %1038 = dma.done.wait [#allocation3 + $0xe], 16 }
  0xef   :  { %1039 = vsyncadd [#allocation3 + $0xe], 4294967280 }
  0xf0   :  { %1040 = dma.done.wait [#allocation3 + $0xf], 16 }
  0xf1   :  { %1041 = vsyncadd [#allocation3 + $0xf], 4294967280  ;;  %s1061_s1 = smov [#allocation6]   ;;  %s384_s29 = sshll.u32 %s1270_s3, 4  ;;  %v374_v4 = vld [vmem:[#allocation2 + $0x8] sm:$0xff]  ;;  %s385_s29 = int_to_ptr.hbm [resolvable:$true] %s384_s29 }
  0xf2   :  { %s382_s10 = sshll.u32 %s1061_s1, 4  ;;  %v375_v5 = vadd.f32 %v374_v4, %v338_v1  ;;  %s1062_s8 = smov 128   ;;  %s383_s10 = int_to_ptr.vmem [resolvable:$true] %s382_s10 }
  0xf3   :  { %s1063_s9 = smov 8  }
  0xf4   :  { %377 = vst [vmem:[#allocation6 + $0x8] sm:$0xff] %v375_v5 }
  0xf5   :  { %390 = dma.vmem_to_hbm [thread:$0]  %s383_s10, 256, %s385_s29, [#allocation7], %s1062_s8, %s1062_s8, %s1063_s9  }
  0xf6   :  { %1042 = dma.done.wait [#allocation7], 256  }
  0xf7   :  { %1043 = vsyncadd [#allocation7], 4294967040 }
  0xf8   :  { %395 = vsyncpa [#allocation7], 1 }
  0xf9   :  { %396 = vsyncmov [#allocation3] }
  0xfc   :  { %s397_s23 = vpop.sfrf %396 }
  0xfd   :  { %p552_p10 = scmp.ne.s32.totalorder %s397_s23, 0 }
  0xff   :  { %401 = shalt.err (%p552_p10)  }
 0x100   :  { %403 = vsyncmov [#allocation3 + $0x1] }
 0x103   :  { %s404_s11 = vpop.sfrf %403 }
 0x104   :  { %p553_p11 = scmp.ne.s32.totalorder %s404_s11, 0 }
 0x106   :  { %408 = shalt.err (%p553_p11)  }
 0x107   :  { %410 = vsyncmov [#allocation3 + $0x2] }
 0x10a   :  { %s411_s3 = vpop.sfrf %410 }
 0x10b   :  { %p554_p12 = scmp.ne.s32.totalorder %s411_s3, 0 }
 0x10d   :  { %415 = shalt.err (%p554_p12)  }
 0x10e   :  { %417 = vsyncmov [#allocation3 + $0x3] }
 0x111   :  { %s418_s12 = vpop.sfrf %417 }
 0x112   :  { %p555_p13 = scmp.ne.s32.totalorder %s418_s12, 0 }
 0x114   :  { %422 = shalt.err (%p555_p13)  }
 0x115   :  { %424 = vsyncmov [#allocation3 + $0x4] }
 0x118   :  { %s425_s7 = vpop.sfrf %424 }
 0x119   :  { %p556_p0 = scmp.ne.s32.totalorder %s425_s7, 0 }
 0x11b   :  { %429 = shalt.err (%p556_p0)  }
 0x11c   :  { %431 = vsyncmov [#allocation3 + $0x5] }
 0x11f   :  { %s432_s14 = vpop.sfrf %431 }
 0x120   :  { %p557_p1 = scmp.ne.s32.totalorder %s432_s14, 0 }
 0x122   :  { %436 = shalt.err (%p557_p1)  }
 0x123   :  { %438 = vsyncmov [#allocation3 + $0x6] }
 0x126   :  { %s439_s15 = vpop.sfrf %438 }
 0x127   :  { %p558_p2 = scmp.ne.s32.totalorder %s439_s15, 0 }
 0x129   :  { %443 = shalt.err (%p558_p2)  }
 0x12a   :  { %445 = vsyncmov [#allocation3 + $0x7] }
 0x12d   :  { %s446_s16 = vpop.sfrf %445 }
 0x12e   :  { %p559_p3 = scmp.ne.s32.totalorder %s446_s16, 0 }
 0x130   :  { %450 = shalt.err (%p559_p3)  }
 0x131   :  { %452 = vsyncmov [#allocation3 + $0x8] }
 0x134   :  { %s453_s17 = vpop.sfrf %452 }
 0x135   :  { %p560_p4 = scmp.ne.s32.totalorder %s453_s17, 0 }
 0x137   :  { %457 = shalt.err (%p560_p4)  }
 0x138   :  { %459 = vsyncmov [#allocation3 + $0x9] }
 0x13b   :  { %s460_s2 = vpop.sfrf %459 }
 0x13c   :  { %p561_p5 = scmp.ne.s32.totalorder %s460_s2, 0 }
 0x13e   :  { %464 = shalt.err (%p561_p5)  }
 0x13f   :  { %466 = vsyncmov [#allocation3 + $0xa] }
 0x142   :  { %s467_s19 = vpop.sfrf %466 }
 0x143   :  { %p562_p6 = scmp.ne.s32.totalorder %s467_s19, 0 }
 0x145   :  { %471 = shalt.err (%p562_p6)  }
 0x146   :  { %473 = vsyncmov [#allocation3 + $0xb] }
 0x149   :  { %s474_s13 = vpop.sfrf %473 }
 0x14a   :  { %p563_p7 = scmp.ne.s32.totalorder %s474_s13, 0 }
 0x14c   :  { %478 = shalt.err (%p563_p7)  }
 0x14d   :  { %480 = vsyncmov [#allocation3 + $0xc] }
 0x150   :  { %s481_s0 = vpop.sfrf %480 }
 0x151   :  { %p564_p8 = scmp.ne.s32.totalorder %s481_s0, 0 }
 0x153   :  { %485 = shalt.err (%p564_p8)  }
 0x154   :  { %487 = vsyncmov [#allocation3 + $0xd] }
 0x157   :  { %s488_s22 = vpop.sfrf %487 }
 0x158   :  { %p565_p9 = scmp.ne.s32.totalorder %s488_s22, 0 }
 0x15a   :  { %492 = shalt.err (%p565_p9)  }
 0x15b   :  { %494 = vsyncmov [#allocation3 + $0xe] }
 0x15e   :  { %s495_s25 = vpop.sfrf %494 }
 0x15f   :  { %p566_p10 = scmp.ne.s32.totalorder %s495_s25, 0 }
 0x161   :  { %499 = shalt.err (%p566_p10)  }
 0x162   :  { %501 = vsyncmov [#allocation3 + $0xf] }
 0x165   :  { %s502_s26 = vpop.sfrf %501 }
 0x166   :  { %p567_p11 = scmp.ne.s32.totalorder %s502_s26, 0 }
 0x168   :  { %506 = shalt.err (%p567_p11)  }

</bundles_post_ra>
